<compile_context>
chip_gen: v5e
topology: v5e:2x2
jax: 0.10.0
libtpu: 0.0.40
codegen_flags: <defaults>
</compile_context>

<pallas_src>
import functools

import jax
import jax.numpy as jnp
from jax import lax
from jax.experimental import pallas as pl
from jax.experimental.pallas import tpu as pltpu


# ----------------------------------------------------------------------------
# Fused kernel: lane-dense partial GAP accumulation + (on last spatial chunk)
#               backbone Linear+ReLU, f2c Linear+Sigmoid, c2y Linear.
# ----------------------------------------------------------------------------
def cbm_fused_kernel(x_ref, w_bb_ref, b_bb_ref, w_f2c_ref, b_f2c_ref,
                     w_c2y_ref, b_c2y_ref, c_ref, y_ref, pooled_acc,
                     *, n_lane_slices):
    # x_ref:      [TB, C, HW_CHUNK]  pixel slab for this (batch, spatial) tile
    # w_bb_ref:   [C, F]  (1/HW folded in), b_bb_ref: [1, F]
    # w_f2c_ref:  [F, Kp], b_f2c_ref: [1, Kp]
    # w_c2y_ref:  [Kp, Yp], b_c2y_ref: [1, Yp]
    # c_ref:      [TB, Kp]  concept preds (post-sigmoid, lane-dense padded)
    # y_ref:      [TB, Yp]  class logits (lane-dense padded)
    # pooled_acc: [TB, C, 128] VMEM scratch, lane-dense GAP accumulator
    s = pl.program_id(1)

    @pl.when(s == 0)
    def _init():
        pooled_acc[...] = jnp.zeros_like(pooled_acc)

    # Hot loop: VPU-only elementwise adds of aligned 128-lane slabs.  No XLU
    # reduce and no narrow masked store per chunk.
    def _acc(i, carry):
        off = pl.multiple_of(i * 128, 128)
        pooled_acc[...] += x_ref[:, :, pl.ds(off, 128)].astype(jnp.float32)
        return carry

    lax.fori_loop(0, n_lane_slices, _acc, 0, unroll=(n_lane_slices <= 8))

    @pl.when(s == pl.num_programs(1) - 1)
    def _finalize():
        # Single 128 -> 1 cross-lane collapse per batch tile.
        pooled = jnp.sum(pooled_acc[...], axis=-1)              # [TB, C]
        # Synthetic backbone head: Linear(C -> F) + ReLU (GAP scale pre-folded).
        feat = jnp.dot(pooled, w_bb_ref[...],
                       preferred_element_type=jnp.float32) + b_bb_ref[...]
        feat = jnp.maximum(feat, 0.0)
        # f2c + Sigmoid (exact divide; runs once per batch tile -> negligible).
        z = jnp.dot(feat, w_f2c_ref[...],
                    preferred_element_type=jnp.float32) + b_f2c_ref[...]
        c = 1.0 / (1.0 + jnp.exp(-z))
        c_ref[...] = c
        # c2y.  Padded sigmoid(0)=0.5 lanes hit zero w_c2y rows -> inert.
        y_ref[...] = jnp.dot(c, w_c2y_ref[...],
                             preferred_element_type=jnp.float32) + b_c2y_ref[...]


# ----------------------------------------------------------------------------
# Tiling / budgeting helpers
# ----------------------------------------------------------------------------
def _round_up(x, m):
    return ((x + m - 1) // m) * m


def _tpu_vmem_capacity_bytes():
    try:
        return int(pltpu.get_tpu_info().vmem_capacity_bytes)
    except Exception:
        return 64 << 20            # conservative fallback: v7x-class 64 MiB


def _budgets_for_generation():
    """Returns (x-slab budget, vmem_limit cap) sized per TPU generation."""
    cap = _tpu_vmem_capacity_bytes()
    if cap >= (96 << 20):          # v5e / v6e: 128 MiB physical VMEM
        return 80 << 20, 100 << 20
    return 32 << 20, 48 << 20      # v7x: 64 MiB physical VMEM


def _pick_batch_tile(B):
    """Keep >= 2 blocks on the 'parallel' batch axis when the tile stays
    8-sublane aligned, so v7x's two TensorCores (and their HBM paths) are used.
    Tiny batches fall back to a single full-dim block (valid layout)."""
    if B >= 256 and B % 128 == 0:
        return 128
    if B % 16 == 0:
        return B // 2
    return B


def _pick_hw_chunk(hw, c, tb, x_budget_bytes, x_itemsize, max_chunk=32768):
    """Pick a 128-multiple spatial chunk whose double-buffered x slab fits the
    per-generation budget, independent of HW divisibility (HW is zero-padded
    up to a multiple of the chunk host-side)."""
    c_sub = _round_up(max(c, 1), 8)
    per_lane = 2 * tb * c_sub * x_itemsize          # 2x: double-buffered x slab
    chunk = (x_budget_bytes // per_lane) // 128 * 128
    chunk = int(max(128, min(chunk, max_chunk, _round_up(hw, 128))))
    # Re-balance at fixed chunk count to minimise zero padding (stays <= chunk,
    # so it stays within budget, and remains a multiple of 128).
    n_chunks = pl.cdiv(_round_up(hw, 128), chunk)
    return int(_round_up(pl.cdiv(hw, n_chunks), 128))


def _vmem_limit_bytes(tb, c, hw_chunk, f, k_pad, y_pad, x_itemsize, cap_bytes):
    c_sub = _round_up(max(c, 1), 8)
    x_block = tb * c_sub * hw_chunk * x_itemsize
    weights = (c_sub * f + 8 * f + f * k_pad + 8 * k_pad
               + k_pad * y_pad + 8 * y_pad) * 4
    outs = tb * (k_pad + y_pad) * 4
    scratch = tb * c_sub * 128 * 4
    est = 2 * (x_block + weights + outs) + scratch   # 2x double buffering
    return int(min(max(est + (4 << 20), 16 << 20), cap_bytes))


# ----------------------------------------------------------------------------
# Python wrapper
# ----------------------------------------------------------------------------
@functools.partial(jax.jit,
                   static_argnames=("num_concepts", "num_classes", "stream_bf16"))
def cbm_forward(pixel_values, params, *, num_concepts, num_classes,
                stream_bf16=False):
    B, C, H, W = pixel_values.shape
    HW = H * W
    F = params["w_bb"].shape[1]
    K_pad = params["w_f2c"].shape[1]
    Y_pad = params["w_c2y"].shape[1]

    x_itemsize = 2 if stream_bf16 else 4
    x_budget, vmem_cap = _budgets_for_generation()

    TB = _pick_batch_tile(B)
    assert B % TB == 0
    HW_CHUNK = _pick_hw_chunk(HW, C, TB, x_budget, x_itemsize)
    HW_PAD = _round_up(HW, HW_CHUNK)
    n_lane_slices = HW_CHUNK // 128

    x_flat = pixel_values.reshape(B, C, HW)
    if stream_bf16:
        # Numerics opt-in: halves bytes on the dominant HBM stream; the GAP
        # accumulation stays f32 inside the kernel.
        x_flat = x_flat.astype(jnp.bfloat16)
    if HW_PAD != HW:
        # Zero spatial padding is inert for the GAP sum (w_bb carries 1/(H*W)).
        x_flat = jnp.pad(x_flat, ((0, 0), (0, 0), (0, HW_PAD - HW)))

    grid = (B // TB, HW_PAD // HW_CHUNK)
    kernel = functools.partial(cbm_fused_kernel, n_lane_slices=n_lane_slices)

    grid_spec = pltpu.PrefetchScalarGridSpec(
        num_scalar_prefetch=0,
        grid=grid,
        in_specs=[
            pl.BlockSpec((TB, C, HW_CHUNK), lambda b, s: (b, 0, s)),
            # Weight/bias index_maps are constant -> fetched once, held in VMEM.
            pl.BlockSpec((C, F), lambda b, s: (0, 0)),
            pl.BlockSpec((1, F), lambda b, s: (0, 0)),
            pl.BlockSpec((F, K_pad), lambda b, s: (0, 0)),
            pl.BlockSpec((1, K_pad), lambda b, s: (0, 0)),
            pl.BlockSpec((K_pad, Y_pad), lambda b, s: (0, 0)),
            pl.BlockSpec((1, Y_pad), lambda b, s: (0, 0)),
        ],
        out_specs=(
            pl.BlockSpec((TB, K_pad), lambda b, s: (b, 0)),
            pl.BlockSpec((TB, Y_pad), lambda b, s: (b, 0)),
        ),
        scratch_shapes=[pltpu.VMEM((TB, C, 128), jnp.float32)],
    )

    flops = 2 * B * (C * F + F * K_pad + K_pad * Y_pad) + B * C * HW_PAD
    bytes_accessed = (x_itemsize * B * C * HW_PAD
                      + 4 * (C * F + F + F * K_pad + K_pad
                             + K_pad * Y_pad + Y_pad + B * (K_pad + Y_pad)))
    cost = pl.CostEstimate(flops=flops, transcendentals=B * K_pad,
                           bytes_accessed=bytes_accessed)

    c_padded, y_padded = pl.pallas_call(
        kernel,
        out_shape=(
            jax.ShapeDtypeStruct((B, K_pad), jnp.float32),
            jax.ShapeDtypeStruct((B, Y_pad), jnp.float32),
        ),
        grid_spec=grid_spec,
        compiler_params=pltpu.CompilerParams(
            dimension_semantics=("parallel", "arbitrary"),
            vmem_limit_bytes=_vmem_limit_bytes(TB, C, HW_CHUNK, F, K_pad, Y_pad,
                                               x_itemsize, vmem_cap),
        ),
        cost_estimate=cost,
    )(x_flat, params["w_bb"], params["b_bb"],
      params["w_f2c"], params["b_f2c"],
      params["w_c2y"], params["b_c2y"])

    return {
        "concept_preds": c_padded[:, :num_concepts],
        "class_preds": y_padded[:, :num_classes],
    }


# ----------------------------------------------------------------------------
# Parameter construction / host-side prep
# ----------------------------------------------------------------------------
def init_params(key, in_channels, feat_dim, num_concepts, num_classes):
    """Logical (unpadded) parameters, matching the PyTorch module layout."""
    k1, k2, k3 = jax.random.split(key, 3)
    scale_bb = 1.0 / jnp.sqrt(in_channels)
    scale_f2c = 1.0 / jnp.sqrt(feat_dim)
    scale_c2y = 1.0 / jnp.sqrt(num_concepts)
    return {
        "w_bb": jax.random.normal(k1, (in_channels, feat_dim), jnp.float32) * scale_bb,
        "b_bb": jnp.zeros((1, feat_dim), jnp.float32),
        "w_f2c": jax.random.normal(k2, (feat_dim, num_concepts), jnp.float32) * scale_f2c,
        "b_f2c": jnp.zeros((1, num_concepts), jnp.float32),
        "w_c2y": jax.random.normal(k3, (num_concepts, num_classes), jnp.float32) * scale_c2y,
        "b_c2y": jnp.zeros((1, num_classes), jnp.float32),
    }


def prepare_params(params, hw):
    """One-time host-side prep: fold the 1/(H*W) GAP scale into w_bb and pad the
    concept/class dims to 128-lane multiples for lane-dense kernel outputs.
    Zero-padded w_c2y rows make the padded sigmoid(0)=0.5 lanes inert."""
    F = params["w_bb"].shape[1]
    K = params["w_f2c"].shape[1]
    Y = params["w_c2y"].shape[1]
    K_pad = _round_up(K, 128)
    Y_pad = _round_up(Y, 128)

    w_f2c = jnp.zeros((F, K_pad), jnp.float32).at[:, :K].set(params["w_f2c"])
    b_f2c = jnp.zeros((1, K_pad), jnp.float32).at[:, :K].set(params["b_f2c"])
    w_c2y = jnp.zeros((K_pad, Y_pad), jnp.float32).at[:K, :Y].set(params["w_c2y"])
    b_c2y = jnp.zeros((1, Y_pad), jnp.float32).at[:, :Y].set(params["b_c2y"])

    return {
        "w_bb": params["w_bb"] * (1.0 / hw),   # GAP scale folded in
        "b_bb": params["b_bb"],
        "w_f2c": w_f2c,
        "b_f2c": b_f2c,
        "w_c2y": w_c2y,
        "b_c2y": b_c2y,
    }


if __name__ == "__main__":
    B, C, H, W = 2, 4, 16, 16       # small NCHW pixel_values
    FEAT = 2048                     # inception_v3 pooled feature size
    NUM_CONCEPTS = 32
    NUM_CLASSES = 8

    key = jax.random.PRNGKey(0)
    kx, kp = jax.random.split(key)
    pixel_values = jax.random.normal(kx, (B, C, H, W), jnp.float32)
    params = init_params(kp, C, FEAT, NUM_CONCEPTS, NUM_CLASSES)
    prepared = prepare_params(params, hw=H * W)

    out = cbm_forward(pixel_values, prepared,
                      num_concepts=NUM_CONCEPTS, num_classes=NUM_CLASSES)
    jax.block_until_ready(out)

    # Pure-JAX reference (precision="highest" so the reference matmuls are full
    # f32; tolerances below also cover a bf16-pass MXU path in-kernel).
    x_flat_ref = pixel_values.reshape(B, C, H * W)
    pooled = jnp.mean(x_flat_ref, axis=-1)
    feat_ref = jnp.maximum(
        jnp.dot(pooled, params["w_bb"], precision="highest") + params["b_bb"], 0.0)
    c_ref = jax.nn.sigmoid(
        jnp.dot(feat_ref, params["w_f2c"], precision="highest") + params["b_f2c"])
    y_ref = jnp.dot(c_ref, params["w_c2y"], precision="highest") + params["b_c2y"]

    assert out["concept_preds"].shape == (B, NUM_CONCEPTS)
    assert out["class_preds"].shape == (B, NUM_CLASSES)
    c_err = float(jnp.max(jnp.abs(out["concept_preds"] - c_ref)))
    y_err = float(jnp.max(jnp.abs(out["class_preds"] - y_ref)))
    assert c_err < 5e-4, f"concept_preds max abs err {c_err}"
    assert y_err < 5e-3, f"class_preds max abs err {y_err}"

    print("KERNEL_OK")
</pallas_src>

<mosaic_0001>
module attributes {stable_mosaic.version = 11 : i64} {
  func.func @cbm_fused_kernel(%arg0: i32, %arg1: i32, %arg2: memref<2x4x256xf32, #tpu.memory_space<vmem>>, %arg3: memref<4x2048xf32, #tpu.memory_space<vmem>>, %arg4: memref<1x2048xf32, #tpu.memory_space<vmem>>, %arg5: memref<2048x128xf32, #tpu.memory_space<vmem>>, %arg6: memref<1x128xf32, #tpu.memory_space<vmem>>, %arg7: memref<128x128xf32, #tpu.memory_space<vmem>>, %arg8: memref<1x128xf32, #tpu.memory_space<vmem>>, %arg9: memref<2x128xf32, #tpu.memory_space<vmem>>, %arg10: memref<2x128xf32, #tpu.memory_space<vmem>>, %arg11: memref<2x4x128xf32, #tpu.memory_space<vmem>>) attributes {dimension_semantics = [#tpu.dimension_semantics<parallel>, #tpu.dimension_semantics<arbitrary>], iteration_bounds = array<i64: 1, 1>, scalar_prefetch = 0 : i64, scratch_operands = 1 : i64, tpu.core_type = #tpu.core_type<tc>, window_params = [{transform_indices = @transform_0, window_bounds = array<i64: 2, 4, 256>}, {pipeline_mode = #tpu.pipeline_mode<synchronous>, transform_indices = @transform_1, window_bounds = array<i64: 4, 2048>}, {pipeline_mode = #tpu.pipeline_mode<synchronous>, transform_indices = @transform_2, window_bounds = array<i64: 1, 2048>}, {pipeline_mode = #tpu.pipeline_mode<synchronous>, transform_indices = @transform_3, window_bounds = array<i64: 2048, 128>}, {pipeline_mode = #tpu.pipeline_mode<synchronous>, transform_indices = @transform_4, window_bounds = array<i64: 1, 128>}, {pipeline_mode = #tpu.pipeline_mode<synchronous>, transform_indices = @transform_5, window_bounds = array<i64: 128, 128>}, {pipeline_mode = #tpu.pipeline_mode<synchronous>, transform_indices = @transform_6, window_bounds = array<i64: 1, 128>}, {transform_indices = @transform_7, window_bounds = array<i64: 2, 128>}, {transform_indices = @transform_8, window_bounds = array<i64: 2, 128>}]} {
    %c0_i32 = arith.constant 0 : i32
    %0 = arith.cmpi eq, %arg1, %c0_i32 : i32
    %1 = arith.extui %0 : i1 to i32
    %c0_i32_0 = arith.constant 0 : i32
    %2 = arith.cmpi ne, %1, %c0_i32_0 : i32
    scf.if %2 {
      %cst = arith.constant 0.000000e+00 : f32
      %20 = vector.broadcast %cst : f32 to vector<2x4x128xf32>
      %c0_20 = arith.constant 0 : index
      %c0_21 = arith.constant 0 : index
      %c0_22 = arith.constant 0 : index
      %21 = vector.load %arg11[%c0_20, %c0_21, %c0_22] : memref<2x4x128xf32, #tpu.memory_space<vmem>>, vector<2x4x128xf32>
      tpu.vector_store %arg11[%c0_20, %c0_21, %c0_22], %20 {strides = array<i32>} : memref<2x4x128xf32, #tpu.memory_space<vmem>>, vector<2x4x128xf32>,
    } else {
    }
    %c0_i32_1 = arith.constant 0 : i32
    %c128_i32 = arith.constant 128 : i32
    %3 = arith.muli %c0_i32_1, %c128_i32 : i32
    %4 = tpu.assume_multiple %3, 128 : i32
    %c0 = arith.constant 0 : index
    %c0_2 = arith.constant 0 : index
    %c0_3 = arith.constant 0 : index
    %5 = vector.load %arg11[%c0, %c0_2, %c0_3] : memref<2x4x128xf32, #tpu.memory_space<vmem>>, vector<2x4x128xf32>
    %c0_4 = arith.constant 0 : index
    %c0_5 = arith.constant 0 : index
    %6 = arith.index_cast %4 : i32 to index
    %7 = vector.load %arg2[%c0_4, %c0_5, %6] : memref<2x4x256xf32, #tpu.memory_space<vmem>>, vector<2x4x128xf32>
    %8 = arith.addf %5, %7 : vector<2x4x128xf32>
    %c0_6 = arith.constant 0 : index
    %c0_7 = arith.constant 0 : index
    %c0_8 = arith.constant 0 : index
    %9 = vector.load %arg11[%c0_6, %c0_7, %c0_8] : memref<2x4x128xf32, #tpu.memory_space<vmem>>, vector<2x4x128xf32>
    tpu.vector_store %arg11[%c0_6, %c0_7, %c0_8], %8 {strides = array<i32>} : memref<2x4x128xf32, #tpu.memory_space<vmem>>, vector<2x4x128xf32>,
    %c1_i32 = arith.constant 1 : i32
    %c128_i32_9 = arith.constant 128 : i32
    %10 = arith.muli %c1_i32, %c128_i32_9 : i32
    %11 = tpu.assume_multiple %10, 128 : i32
    %c0_10 = arith.constant 0 : index
    %c0_11 = arith.constant 0 : index
    %c0_12 = arith.constant 0 : index
    %12 = vector.load %arg11[%c0_10, %c0_11, %c0_12] : memref<2x4x128xf32, #tpu.memory_space<vmem>>, vector<2x4x128xf32>
    %c0_13 = arith.constant 0 : index
    %c0_14 = arith.constant 0 : index
    %13 = arith.index_cast %11 : i32 to index
    %14 = vector.load %arg2[%c0_13, %c0_14, %13] : memref<2x4x256xf32, #tpu.memory_space<vmem>>, vector<2x4x128xf32>
    %15 = arith.addf %12, %14 : vector<2x4x128xf32>
    %c0_15 = arith.constant 0 : index
    %c0_16 = arith.constant 0 : index
    %c0_17 = arith.constant 0 : index
    %16 = vector.load %arg11[%c0_15, %c0_16, %c0_17] : memref<2x4x128xf32, #tpu.memory_space<vmem>>, vector<2x4x128xf32>
    tpu.vector_store %arg11[%c0_15, %c0_16, %c0_17], %15 {strides = array<i32>} : memref<2x4x128xf32, #tpu.memory_space<vmem>>, vector<2x4x128xf32>,
    %c2_i32 = arith.constant 2 : i32
    %c0_i32_18 = arith.constant 0 : i32
    %17 = arith.cmpi eq, %arg1, %c0_i32_18 : i32
    %18 = arith.extui %17 : i1 to i32
    %c0_i32_19 = arith.constant 0 : i32
    %19 = arith.cmpi ne, %18, %c0_i32_19 : i32
    scf.if %19 {
      %c0_20 = arith.constant 0 : index
      %c0_21 = arith.constant 0 : index
      %c0_22 = arith.constant 0 : index
      %20 = vector.load %arg11[%c0_20, %c0_21, %c0_22] : memref<2x4x128xf32, #tpu.memory_space<vmem>>, vector<2x4x128xf32>
      %cst = arith.constant dense<0.000000e+00> : vector<2x4xf32>
      %21 = vector.multi_reduction <add>, %20, %cst [2] : vector<2x4x128xf32> to vector<2x4xf32>
      %c0_23 = arith.constant 0 : index
      %c0_24 = arith.constant 0 : index
      %22 = vector.load %arg3[%c0_23, %c0_24] : memref<4x2048xf32, #tpu.memory_space<vmem>>, vector<4x2048xf32>
      %cst_25 = arith.constant dense<0.000000e+00> : vector<2x2048xf32>
      %23 = tpu.matmul %21, %22, %cst_25 {dimension_numbers = #tpu.dot_dimension_numbers<[1], [0], [0], [1], [0, 0, 1, 1], [], []>} : vector<2x4xf32>, vector<4x2048xf32>, vector<2x2048xf32> -> vector<2x2048xf32>
      %c0_26 = arith.constant 0 : index
      %c0_27 = arith.constant 0 : index
      %24 = vector.load %arg4[%c0_26, %c0_27] : memref<1x2048xf32, #tpu.memory_space<vmem>>, vector<1x2048xf32>
      %25 = vector.broadcast %24 : vector<1x2048xf32> to vector<2x2048xf32>
      %26 = arith.addf %23, %25 : vector<2x2048xf32>
      %cst_28 = arith.constant 0.000000e+00 : f32
      %27 = vector.broadcast %cst_28 : f32 to vector<2x2048xf32>
      %28 = arith.maximumf %26, %27 : vector<2x2048xf32>
      %c0_29 = arith.constant 0 : index
      %c0_30 = arith.constant 0 : index
      %29 = vector.load %arg5[%c0_29, %c0_30] : memref<2048x128xf32, #tpu.memory_space<vmem>>, vector<2048x128xf32>
      %cst_31 = arith.constant dense<0.000000e+00> : vector<2x128xf32>
      %30 = tpu.matmul %28, %29, %cst_31 {dimension_numbers = #tpu.dot_dimension_numbers<[1], [0], [0], [1], [0, 0, 1, 1], [], []>} : vector<2x2048xf32>, vector<2048x128xf32>, vector<2x128xf32> -> vector<2x128xf32>
      %c0_32 = arith.constant 0 : index
      %c0_33 = arith.constant 0 : index
      %31 = vector.load %arg6[%c0_32, %c0_33] : memref<1x128xf32, #tpu.memory_space<vmem>>, vector<1x128xf32>
      %32 = vector.broadcast %31 : vector<1x128xf32> to vector<2x128xf32>
      %33 = arith.addf %30, %32 : vector<2x128xf32>
      %cst_34 = arith.constant 0.000000e+00 : f32
      %34 = vector.broadcast %cst_34 : f32 to vector<2x128xf32>
      %35 = arith.subf %34, %33 : vector<2x128xf32>
      %36 = math.exp %35 : vector<2x128xf32>
      %cst_35 = arith.constant 1.000000e+00 : f32
      %37 = vector.broadcast %cst_35 : f32 to vector<2x128xf32>
      %38 = arith.addf %37, %36 : vector<2x128xf32>
      %cst_36 = arith.constant 1.000000e+00 : f32
      %39 = vector.broadcast %cst_36 : f32 to vector<2x128xf32>
      %40 = arith.divf %39, %38 : vector<2x128xf32>
      %c0_37 = arith.constant 0 : index
      %c0_38 = arith.constant 0 : index
      %41 = vector.load %arg9[%c0_37, %c0_38] : memref<2x128xf32, #tpu.memory_space<vmem>>, vector<2x128xf32>
      tpu.vector_store %arg9[%c0_37, %c0_38], %40 {strides = array<i32>} : memref<2x128xf32, #tpu.memory_space<vmem>>, vector<2x128xf32>,
      %c0_39 = arith.constant 0 : index
      %c0_40 = arith.constant 0 : index
      %42 = vector.load %arg7[%c0_39, %c0_40] : memref<128x128xf32, #tpu.memory_space<vmem>>, vector<128x128xf32>
      %cst_41 = arith.constant dense<0.000000e+00> : vector<2x128xf32>
      %43 = tpu.matmul %40, %42, %cst_41 {dimension_numbers = #tpu.dot_dimension_numbers<[1], [0], [0], [1], [0, 0, 1, 1], [], []>} : vector<2x128xf32>, vector<128x128xf32>, vector<2x128xf32> -> vector<2x128xf32>
      %c0_42 = arith.constant 0 : index
      %c0_43 = arith.constant 0 : index
      %44 = vector.load %arg8[%c0_42, %c0_43] : memref<1x128xf32, #tpu.memory_space<vmem>>, vector<1x128xf32>
      %45 = vector.broadcast %44 : vector<1x128xf32> to vector<2x128xf32>
      %46 = arith.addf %43, %45 : vector<2x128xf32>
      %c0_44 = arith.constant 0 : index
      %c0_45 = arith.constant 0 : index
      %47 = vector.load %arg10[%c0_44, %c0_45] : memref<2x128xf32, #tpu.memory_space<vmem>>, vector<2x128xf32>
      tpu.vector_store %arg10[%c0_44, %c0_45], %46 {strides = array<i32>} : memref<2x128xf32, #tpu.memory_space<vmem>>, vector<2x128xf32>,
    } else {
    }
    return
  }
  func.func @transform_0(%arg0: i32, %arg1: i32) -> (i32, i32, i32) {
    %c0_i32 = arith.constant 0 : i32
    %c0_i32_0 = arith.constant 0 : i32
    return %arg0, %c0_i32, %arg1 : i32, i32, i32
  }
  func.func @transform_1(%arg0: i32, %arg1: i32) -> (i32, i32) {
    %c0_i32 = arith.constant 0 : i32
    %c0_i32_0 = arith.constant 0 : i32
    %c0_i32_1 = arith.constant 0 : i32
    return %c0_i32, %c0_i32_0 : i32, i32
  }
  func.func @transform_2(%arg0: i32, %arg1: i32) -> (i32, i32) {
    %c0_i32 = arith.constant 0 : i32
    %c0_i32_0 = arith.constant 0 : i32
    %c0_i32_1 = arith.constant 0 : i32
    return %c0_i32, %c0_i32_0 : i32, i32
  }
  func.func @transform_3(%arg0: i32, %arg1: i32) -> (i32, i32) {
    %c0_i32 = arith.constant 0 : i32
    %c0_i32_0 = arith.constant 0 : i32
    %c0_i32_1 = arith.constant 0 : i32
    return %c0_i32, %c0_i32_0 : i32, i32
  }
  func.func @transform_4(%arg0: i32, %arg1: i32) -> (i32, i32) {
    %c0_i32 = arith.constant 0 : i32
    %c0_i32_0 = arith.constant 0 : i32
    %c0_i32_1 = arith.constant 0 : i32
    return %c0_i32, %c0_i32_0 : i32, i32
  }
  func.func @transform_5(%arg0: i32, %arg1: i32) -> (i32, i32) {
    %c0_i32 = arith.constant 0 : i32
    %c0_i32_0 = arith.constant 0 : i32
    %c0_i32_1 = arith.constant 0 : i32
    return %c0_i32, %c0_i32_0 : i32, i32
  }
  func.func @transform_6(%arg0: i32, %arg1: i32) -> (i32, i32) {
    %c0_i32 = arith.constant 0 : i32
    %c0_i32_0 = arith.constant 0 : i32
    %c0_i32_1 = arith.constant 0 : i32
    return %c0_i32, %c0_i32_0 : i32, i32
  }
  func.func @transform_7(%arg0: i32, %arg1: i32) -> (i32, i32) {
    %c0_i32 = arith.constant 0 : i32
    %c0_i32_0 = arith.constant 0 : i32
    return %arg0, %c0_i32 : i32, i32
  }
  func.func @transform_8(%arg0: i32, %arg1: i32) -> (i32, i32) {
    %c0_i32 = arith.constant 0 : i32
    %c0_i32_0 = arith.constant 0 : i32
    return %arg0, %c0_i32 : i32, i32
  }
}

</mosaic_0001>

<bundles_post_ra>
// kernel: cbm_forward.1
= control target key start
LH: loop header
LB: loop body
LE: loop exit
PB: predicated region body
PF: predicated region fallthrough
CT: control target
= control target key end

     0   :  { %14 = vsyncpa [#allocation4], 0  ;;  %s1587_s0 = inlined_call_operand.vmem [shape: f32[2,4,256], index: 0, kind: input, shape index: {}]   ;;  %s1588_s1 = inlined_call_operand.hbm [shape: f32[4,2048], index: 1, kind: input, shape index: {}]   ;;  %s1589_s2 = inlined_call_operand.vmem [shape: f32[1,2048], index: 2, kind: input, shape index: {}]   ;;  %s1590_s3 = inlined_call_operand.hbm [shape: f32[2048,128], index: 3, kind: input, shape index: {}]   ;;  %s1591_s4 = inlined_call_operand.vmem [shape: f32[1,128], index: 4, kind: input, shape index: {}]   ;;  %s1592_s5 = inlined_call_operand.vmem [shape: f32[128,128], index: 5, kind: input, shape index: {}]   ;;  %s1593_s6 = inlined_call_operand.vmem [shape: f32[1,128], index: 6, kind: input, shape index: {}]   ;;  %s1594_s7 = inlined_call_operand.hbm [shape: f32[2,128], index: 7, kind: output, shape index: {0}]   ;;  %s1595_s8 = inlined_call_operand.hbm [shape: f32[2,128], index: 8, kind: output, shape index: {1}]  }
   0x1   :  { %15 = vsyncpa [#allocation7], 0 }
   0x2   :  { %16 = vsyncpa [#allocation5], 0 }
   0x3   :  { %17 = vsyncpa [#allocation10], 0  ;;  %s25_s29 = sshll.u32 %s1588_s1, 4  ;;  %s1379_s30 = smov [#allocation3]   ;;  %s26_s29 = int_to_ptr.hbm [resolvable:$true] %s25_s29 }
   0x4   :  { %s27_s9 = sshll.u32 %s1379_s30, 4  ;;  %s37_s12 = sshll.u32 %s1590_s3, 4  ;;  %s28_s9 = int_to_ptr.vmem [resolvable:$true] %s27_s9  ;;  %s38_s12 = int_to_ptr.hbm [resolvable:$true] %s37_s12 }
   0x5   :  { %30 = dma.hbm_to_vmem [thread:$0]  %s26_s29, 1024, %s28_s9, [#allocation4]  }
   0x6   :  { %s1380_s13 = smov [#allocation6]   ;;  %s1381_s15 = smov 128  }
   0x7   :  { %s39_s14 = sshll.u32 %s1380_s13, 4  ;;  %s1382_s16 = smov 8   ;;  %s40_s14 = int_to_ptr.vmem [resolvable:$true] %s39_s14 }
   0x8   :  { %45 = dma.hbm_to_vmem [thread:$0]  %s38_s12, 32768, %s40_s14, [#allocation7], %s1381_s15, %s1381_s15, %s1382_s16  }
   0x9   :  { %1371 = dma.done.wait [#allocation4], 1024  }
   0xa   :  { %1372 = vsyncadd [#allocation4], 4294966272 }
   0xb   :  { %1373 = dma.done.wait [#allocation7], 32768  }
   0xc   :  { %1374 = vsyncadd [#allocation7], 4294934528  ;;  %v1383_v0 = vmov 0.0   ;;  %v68_v1 = vld [vmem:[%s1587_s0] sm:$0xf]  ;;  %vm88_vm0 = vcmask 1043456   ;;  %v141_v35 = vlaneseq }
   0xd   :  { %64 = vst [vmem:[#allocation2] sm:$0xf] %v1383_v0  ;;  %v69_v2 = vld [vmem:[%s1587_s0 + $0x8] sm:$0xf]  ;;  %v1228_v7 = vld [vmem:[%s1587_s0 + $0x4] sm:$0xf] }
   0xe   :  { %65 = vst [vmem:[#allocation2 + $0x4] sm:$0xf] %v1383_v0  ;;  %v1229_v8 = vld [vmem:[%s1587_s0 + $0xc] sm:$0xf]  ;;  %v97_v17 = vld [vmem:[#allocation3 + $0x10] sm:$0xff]  ;;  %v95_v18 = vld [vmem:[#allocation3] sm:$0xff] }
   0xf   :  { %159 = vst [vmem:[#allocation1 + $0x20] ss:$2 sm:$0xff] %v97_v17  ;;  %v96_v19 = vld [vmem:[#allocation3 + $0x8] sm:$0xff]  ;;  %v101_v20 = vld [vmem:[#allocation3 + $0x30] sm:$0xff]  ;;  %v98_v26 = vld [vmem:[#allocation3 + $0x18] sm:$0xff]  ;;  %v142_v36 = vand.u32 127, %v141_v35 }
  0x10   :  { %155 = vst [vmem:[#allocation1] ss:$2 sm:$0xff] %v95_v18  ;;  %v100_v25 = vld [vmem:[#allocation3 + $0x28] sm:$0xff]  ;;  %v99_v29 = vld [vmem:[#allocation3 + $0x20] sm:$0xff]  ;;  %v102_v31 = vld [vmem:[#allocation3 + $0x38] sm:$0xff]  ;;  %vm145_vm1 = vcmask 1041409  }
  0x11   :  { %157 = vst [vmem:[#allocation1 + $0x10] ss:$2 sm:$0xff] %v96_v19  ;;  %vm182_vm2 = vcmask 31744   ;;  %v568_v42 = vld [vmem:[#allocation6 + $0x78] sm:$0xff]  ;;  %v567_v43 = vld [vmem:[#allocation6 + $0x70] sm:$0xff]  ;;  %v566_v44 = vld [vmem:[#allocation6 + $0x68] sm:$0xff] }
  0x12   :  { %161 = vst [vmem:[#allocation1 + $0x30] ss:$2 sm:$0xff] %v98_v26  ;;  %v565_v48 = vld [vmem:[#allocation6 + $0x60] sm:$0xff]  ;;  %v564_v49 = vld [vmem:[#allocation6 + $0x58] sm:$0xff]  ;;  %v563_v50 = vld [vmem:[#allocation6 + $0x50] sm:$0xff]  ;;  %s1201_s12 = sshll.u32 %s1594_s7, 4  ;;  %s1202_s12 = int_to_ptr.hbm [resolvable:$true] %s1201_s12 }
  0x13   :  { %v562_v54 = vld [vmem:[#allocation6 + $0x48] sm:$0xff]  ;;  %v561_v55 = vld [vmem:[#allocation6 + $0x40] sm:$0xff]  ;;  %v560_v56 = vld [vmem:[#allocation6 + $0x38] sm:$0xff]  ;;  %s1385_s15 = smov [#allocation9]   ;;  %s1212_s3 = sshll.u32 %s1595_s8, 4  ;;  %s1213_s3 = int_to_ptr.hbm [resolvable:$true] %s1212_s3 }
  0x14   :  { %v66_v3 = vld [vmem:[#allocation2] sm:$0xf]  ;;  %v599_v60 = vld [vmem:[#allocation6 + $0x170] sm:$0xff]  ;;  %v598_v0 = vld [vmem:[#allocation6 + $0x168] sm:$0xff]  ;;  %s1210_s16 = sshll.u32 %s1385_s15, 4  ;;  %s1211_s16 = int_to_ptr.vmem [resolvable:$true] %s1210_s16 }
  0x15   :  { %v70_v4 = vadd.f32 %v68_v1, %v66_v3  ;;  %v67_v5 = vld [vmem:[#allocation2 + $0x4] sm:$0xf]  ;;  %v559_v61 = vld [vmem:[#allocation6 + $0x30] sm:$0xff]  ;;  %v558_v1 = vld [vmem:[#allocation6 + $0x28] sm:$0xff] }
  0x16   :  { %v71_v6 = vadd.f32 %v69_v2, %v67_v5  ;;  %v166_v21 = vld.sshfl [vmem:[#allocation1 + $0x20] sm:$0xff pattern:$0x75316420]  ;;  %v167_v22 = vld.sshfl [vmem:[#allocation1 + $0x28] sm:$0xff pattern:$0x75316420] }
  0x17   :  { %72 = vst [vmem:[#allocation2] sm:$0xf] %v70_v4  ;;  %v162_v23 = vld.sshfl [vmem:[#allocation1] sm:$0xff pattern:$0x75316420]  ;;  %v600_v57 = vld [vmem:[#allocation6 + $0x178] sm:$0xff] }
  0x18   :  { %73 = vst [vmem:[#allocation2 + $0x4] sm:$0xf] %v71_v6  ;;  %1230 = vmatpush.msk.msra.mxu1 %vm88_vm0, %v162_v23  ;;  %v164_v24 = vld.sshfl [vmem:[#allocation1 + $0x10] sm:$0xff pattern:$0x75316420]  ;;  %v616_v58 = vld [vmem:[#allocation6 + $0x1f8] sm:$0xff] }
  0x19   :  { %172 = vst [vmem:[#allocation1 + $0x20] ss:$2 sm:$0xff] %v101_v20  ;;  %1234 = vmatpush.msk.msra.mxu2 %vm88_vm0, %v164_v24  ;;  %v165_v27 = vld.sshfl [vmem:[#allocation1 + $0x18] sm:$0xff pattern:$0x75316420]  ;;  %v584_v59 = vld [vmem:[#allocation6 + $0xf8] sm:$0xff] }
  0x1a   :  { %171 = vst [vmem:[#allocation1 + $0x10] ss:$2 sm:$0xff] %v100_v25  ;;  %1236 = vmatpush.msk.msra.mxu3 %vm88_vm0, %v165_v27  ;;  %v163_v30 = vld.sshfl [vmem:[#allocation1 + $0x8] sm:$0xff pattern:$0x75316420]  ;;  %v615_v62 = vld [vmem:[#allocation6 + $0x1f0] sm:$0xff] }
  0x1b   :  { %170 = vst [vmem:[#allocation1] ss:$2 sm:$0xff] %v99_v29  ;;  %1232 = vmatpush.msk.msrb.mxu1 %vm88_vm0, %v163_v30  ;;  %1238 = vmatpush.msk.msrb.mxu2 %vm88_vm0, %v166_v21  ;;  %v169_v32 = vld.sshfl [vmem:[#allocation1 + $0x38] sm:$0xff pattern:$0x75316420]  ;;  %v583_v63 = vld [vmem:[#allocation6 + $0xf0] sm:$0xff] }
  0x1c   :  { %v168_v33 = vld.sshfl [vmem:[#allocation1 + $0x30] sm:$0xff pattern:$0x75316420]  ;;  %1244 = vmatpush.msk.msrb.mxu3 %vm88_vm0, %v169_v32  ;;  %v614_v2 = vld [vmem:[#allocation6 + $0x1e8] sm:$0xff]  ;;  %v592_v24 = vld [vmem:[#allocation6 + $0x138] sm:$0xff] }
  0x1d   :  { %173 = vst [vmem:[#allocation1 + $0x30] ss:$2 sm:$0xff] %v102_v31  ;;  %v582_v3 = vld [vmem:[#allocation6 + $0xe8] sm:$0xff]  ;;  %v597_v4 = vld [vmem:[#allocation6 + $0x160] sm:$0xff]  ;;  %v576_v25 = vld [vmem:[#allocation6 + $0xb8] sm:$0xff] }
  0x1e   :  { %v74_v9 = vld [vmem:[#allocation2] sm:$0xf]  ;;  %v557_v5 = vld [vmem:[#allocation6 + $0x20] sm:$0xff]  ;;  %v578_v17 = vld [vmem:[#allocation6 + $0xc8] sm:$0xff] }
  0x1f   :  { %v79_v10 = vadd.f32 %v1228_v7, %v74_v9  ;;  %v75_v11 = vld [vmem:[#allocation2 + $0x4] sm:$0xf]  ;;  %v581_v6 = vld [vmem:[#allocation6 + $0xe0] sm:$0xff]  ;;  %v554_v18 = vld [vmem:[#allocation6 + $0x8] sm:$0xff] }
  0x20   :  { %v80_v12 = vadd.f32 %v1229_v8, %v75_v11  ;;  %v178_v28 = vld.sshfl [vmem:[#allocation1 + $0x20] sm:$0xff pattern:$0x75316420]  ;;  %v179_v51 = vld.sshfl [vmem:[#allocation1 + $0x28] sm:$0xff pattern:$0x75316420] }
  0x21   :  { %81 = vst [vmem:[#allocation2] sm:$0xf] %v79_v10  ;;  %1254 = vmatpush.msk.msra.mxu0 %vm88_vm0, %v178_v28  ;;  %v176_v46 = vld.sshfl [vmem:[#allocation1 + $0x10] sm:$0xff pattern:$0x75316420]  ;;  %v596_v8 = vld [vmem:[#allocation6 + $0x158] sm:$0xff] }
  0x22   :  { %82 = vst [vmem:[#allocation2 + $0x4] sm:$0xf] %v80_v12  ;;  %v174_v41 = vld.sshfl [vmem:[#allocation1] sm:$0xff pattern:$0x75316420]  ;;  %v613_v7 = vld [vmem:[#allocation6 + $0x1e0] sm:$0xff] }
  0x23   :  { %813 = vmatpush.msrb.mxu0 %v568_v42  ;;  %v175_v45 = vld.sshfl [vmem:[#allocation1 + $0x8] sm:$0xff pattern:$0x75316420]  ;;  %v177_v47 = vld.sshfl [vmem:[#allocation1 + $0x18] sm:$0xff pattern:$0x75316420] }
  0x24   :  { %v180_v52 = vld.sshfl [vmem:[#allocation1 + $0x30] sm:$0xff pattern:$0x75316420]  ;;  %v181_v53 = vld.sshfl [vmem:[#allocation1 + $0x38] sm:$0xff pattern:$0x75316420] }
  0x25   :  { %814 = vmatpush.msrb.mxu0 %v567_v43  ;;  %v580_v9 = vld [vmem:[#allocation6 + $0xd8] sm:$0xff]  ;;  %v595_v12 = vld [vmem:[#allocation6 + $0x150] sm:$0xff]  ;;  %v610_v19 = vld [vmem:[#allocation6 + $0x1c8] sm:$0xff] }
  0x26   :  { %v556_v10 = vld [vmem:[#allocation6 + $0x18] sm:$0xff]  ;;  %v593_v20 = vld [vmem:[#allocation6 + $0x140] sm:$0xff]  ;;  %v591_v28 = vld [vmem:[#allocation6 + $0x130] sm:$0xff] }
  0x27   :  { %815 = vmatpush.msrb.mxu0 %v566_v44  ;;  %v612_v11 = vld [vmem:[#allocation6 + $0x1d8] sm:$0xff]  ;;  %v577_v21 = vld [vmem:[#allocation6 + $0xc0] sm:$0xff]  ;;  %v575_v29 = vld [vmem:[#allocation6 + $0xb0] sm:$0xff] }
  0x28   :  { %v86_v13 = vld [vmem:[#allocation2] sm:$0xf]  ;;  %v609_v23 = vld [vmem:[#allocation6 + $0x1c0] sm:$0xff]  ;;  %v631_v30 = vld [vmem:[#allocation6 + $0x270] sm:$0xff] }
  0x29   :  { %v89_v14 = vsel %vm88_vm0, %v86_v13, 0.0  ;;  %v87_v15 = vld [vmem:[#allocation2 + $0x4] sm:$0xf]  ;;  %816 = vmatpush.msrb.mxu0 %v565_v48  ;;  %v579_v13 = vld [vmem:[#allocation6 + $0xd0] sm:$0xff]  ;;  %v590_v32 = vld [vmem:[#allocation6 + $0x128] sm:$0xff] }
  0x2a   :  { %90 = vadd.xlane.f32.xlu0 %v89_v14  ;;  %v92_v16 = vsel %vm88_vm0, %v87_v15, 0.0  ;;  %v555_v14 = vld [vmem:[#allocation6 + $0x10] sm:$0xff]  ;;  %v632_v26 = vld [vmem:[#allocation6 + $0x278] sm:$0xff]  ;;  %v606_v35 = vld [vmem:[#allocation6 + $0x1a8] sm:$0xff] }
  0x2b   :  { %817 = vmatpush.msrb.mxu0 %v564_v49  ;;  %v611_v15 = vld [vmem:[#allocation6 + $0x1d0] sm:$0xff]  ;;  %v608_v27 = vld [vmem:[#allocation6 + $0x1b8] sm:$0xff]  ;;  %v586_v48 = vld [vmem:[#allocation6 + $0x108] sm:$0xff] }
  0x2c   :  { %v607_v31 = vld [vmem:[#allocation6 + $0x1b0] sm:$0xff]  ;;  %v628_v42 = vld [vmem:[#allocation6 + $0x258] sm:$0xff]  ;;  %v570_v49 = vld [vmem:[#allocation6 + $0x88] sm:$0xff] }
  0x2d   :  { %818 = vmatpush.msrb.mxu0 %v563_v50  ;;  %v604_v43 = vld [vmem:[#allocation6 + $0x198] sm:$0xff]  ;;  %v587_v44 = vld [vmem:[#allocation6 + $0x110] sm:$0xff]  ;;  %v626_v50 = vld [vmem:[#allocation6 + $0x248] sm:$0xff] }
  0x2f   :  { %819 = vmatpush.msrb.mxu0 %v562_v54  ;;  %v569_v54 = vld [vmem:[#allocation6 + $0x80] sm:$0xff] }
  0x31   :  { %820 = vmatpush.msrb.mxu0 %v561_v55  ;;  %v601_v55 = vld [vmem:[#allocation6 + $0x180] sm:$0xff] }
  0x32   :  { %93 = vadd.xlane.f32.xlu0 %v92_v16  ;;  %v594_v16 = vld [vmem:[#allocation6 + $0x148] sm:$0xff] }
  0x33   :  { %821 = vmatpush.msrb.mxu0 %v560_v56  ;;  %v648_v56 = vld [vmem:[#allocation6 + $0x2f8] sm:$0xff] }
  0x35   :  { %822 = vmatpush.msrb.mxu0 %v559_v61  ;;  %v679_v61 = vld [vmem:[#allocation6 + $0x3f0] sm:$0xff] }
  0x37   :  { %823 = vmatpush.msrb.mxu0 %v558_v1  ;;  %v678_v1 = vld [vmem:[#allocation6 + $0x3e8] sm:$0xff] }
  0x39   :  { %824 = vmatpush.msrb.mxu0 %v557_v5  ;;  %v677_v5 = vld [vmem:[#allocation6 + $0x3e0] sm:$0xff] }
  0x3b   :  { %825 = vmatpush.msrb.mxu0 %v556_v10  ;;  %v659_v10 = vld [vmem:[#allocation6 + $0x350] sm:$0xff] }
  0x3d   :  { %826 = vmatpush.msrb.mxu0 %v555_v14  ;;  %v658_v14 = vld [vmem:[#allocation6 + $0x348] sm:$0xff] }
  0x3f   :  { %827 = vmatpush.msrb.mxu0 %v554_v18  ;;  %v657_v18 = vld [vmem:[#allocation6 + $0x340] sm:$0xff] }
  0x9d   :  { %v91_v34 = vpop.xlane.xlu0 %90 }
  0x9e   :  { %v143_v38 = vperm.slane %v91_v34, %v142_v36  ;;  %v630_v34 = vld [vmem:[#allocation6 + $0x268] sm:$0xff] }
  0xa5   :  { %v94_v37 = vpop.xlane.xlu0 %93 }
  0xa6   :  { %v144_v39 = vperm.slane %v94_v37, %v142_v36  ;;  %v589_v36 = vld [vmem:[#allocation6 + $0x120] sm:$0xff] }
  0xa7   :  { %v573_v37 = vld [vmem:[#allocation6 + $0xa0] sm:$0xff] }
  0xa8   :  { %v1458_v40 = vsel %vm145_vm1, %v144_v39, %v143_v38  ;;  %v629_v38 = vld [vmem:[#allocation6 + $0x260] sm:$0xff] }
  0xa9   :  { %1231 = vmatmul.msk.f32.vlgmr.msra.gmra.mxu1 %vm182_vm2, %v1458_v40  ;;  %1235 = vmatmul.msk.f32.vlgmr.msra.gmra.mxu2 %vm182_vm2, %v1458_v40  ;;  %v605_v39 = vld [vmem:[#allocation6 + $0x1a0] sm:$0xff] }
  0xaa   :  { %1237 = vmatmul.msk.f32.vlgmr.msra.gmra.mxu3 %vm182_vm2, %v1458_v40  ;;  %1255 = vmatmul.msk.f32.vlgmr.msra.gmra.mxu0 %vm182_vm2, %v1458_v40 }
  0xab   :  { %1240 = vmatpush.msk.msra.mxu1 %vm88_vm0, %v167_v22  ;;  %1242 = vmatpush.msk.msra.mxu2 %vm88_vm0, %v168_v33  ;;  %v553_v22 = vld [vmem:[#allocation6] sm:$0xff]  ;;  %v574_v33 = vld [vmem:[#allocation6 + $0xa8] sm:$0xff] }
  0xac   :  { %1246 = vmatpush.msk.msra.mxu3 %vm88_vm0, %v174_v41  ;;  %828 = vmatpush.msrb.mxu0 %v553_v22  ;;  %v572_v41 = vld [vmem:[#allocation6 + $0x98] sm:$0xff] }
  0xad   :  { %v640_v22 = vld [vmem:[#allocation6 + $0x2b8] sm:$0xff] }
  0xae   :  { %893 = vmatpush.msra.mxu0 %v632_v26  ;;  %v619_v26 = vld [vmem:[#allocation6 + $0x210] sm:$0xff] }
  0xb0   :  { %894 = vmatpush.msra.mxu0 %v631_v30  ;;  %v618_v30 = vld [vmem:[#allocation6 + $0x208] sm:$0xff] }
  0xb1   :  { %1233 = vmatmul.msk.f32.vlgmr.msrb.gmra.mxu1 %vm182_vm2, %v1458_v40  ;;  %1239 = vmatmul.msk.f32.vlgmr.msrb.gmra.mxu2 %vm182_vm2, %v1458_v40 }
  0xb2   :  { %1245 = vmatmul.msk.f32.vlgmr.msrb.gmra.mxu3 %vm182_vm2, %v1458_v40  ;;  %1248 = vmatpush.msk.msrb.mxu1 %vm88_vm0, %v175_v45  ;;  %v571_v45 = vld [vmem:[#allocation6 + $0x90] sm:$0xff] }
  0xb3   :  { %1250 = vmatpush.msk.msrb.mxu2 %vm88_vm0, %v176_v46  ;;  %1252 = vmatpush.msk.msrb.mxu3 %vm88_vm0, %v177_v47  ;;  %v627_v46 = vld [vmem:[#allocation6 + $0x250] sm:$0xff] }
  0xb4   :  { %895 = vmatpush.msra.mxu0 %v630_v34  ;;  %v603_v47 = vld [vmem:[#allocation6 + $0x190] sm:$0xff]  ;;  %v617_v34 = vld [vmem:[#allocation6 + $0x200] sm:$0xff] }
  0xb6   :  { %896 = vmatpush.msra.mxu0 %v629_v38  ;;  %v636_v38 = vld [vmem:[#allocation6 + $0x298] sm:$0xff] }
  0xb8   :  { %897 = vmatpush.msra.mxu0 %v628_v42  ;;  %v650_v42 = vld [vmem:[#allocation6 + $0x308] sm:$0xff] }
  0xb9   :  { %1241 = vmatmul.msk.f32.vlgmr.msra.gmra.mxu1 %vm182_vm2, %v1458_v40  ;;  %1243 = vmatmul.msk.f32.vlgmr.msra.gmra.mxu2 %vm182_vm2, %v1458_v40 }
  0xba   :  { %1247 = vmatmul.msk.f32.vlgmr.msra.gmra.mxu3 %vm182_vm2, %v1458_v40  ;;  %1256 = vmatpush.msk.msra.mxu1 %vm88_vm0, %v179_v51  ;;  %v602_v51 = vld [vmem:[#allocation6 + $0x188] sm:$0xff] }
  0xbb   :  { %1258 = vmatpush.msk.msra.mxu2 %vm88_vm0, %v180_v52  ;;  %1260 = vmatpush.msk.msra.mxu3 %vm88_vm0, %v181_v53  ;;  %v585_v52 = vld [vmem:[#allocation6 + $0x100] sm:$0xff]  ;;  %v664_v53 = vld [vmem:[#allocation6 + $0x378] sm:$0xff] }
  0xbc   :  { %898 = vmatpush.msra.mxu0 %v627_v46  ;;  %v665_v46 = vld [vmem:[#allocation6 + $0x380] sm:$0xff] }
  0xbe   :  { %899 = vmatpush.msra.mxu0 %v626_v50 }
  0xc1   :  { %1249 = vmatmul.msk.f32.vlgmr.msrb.gmra.mxu1 %vm182_vm2, %v1458_v40  ;;  %1251 = vmatmul.msk.f32.vlgmr.msrb.gmra.mxu2 %vm182_vm2, %v1458_v40 }
  0xc2   :  { %1253 = vmatmul.msk.f32.vlgmr.msrb.gmra.mxu3 %vm182_vm2, %v1458_v40  ;;  %853 = vmatpush.msrb.mxu2 %v600_v57  ;;  %v680_v57 = vld [vmem:[#allocation6 + $0x3f8] sm:$0xff] }
  0xc3   :  { %873 = vmatpush.msrb.mxu3 %v616_v58  ;;  %833 = vmatpush.msrb.mxu1 %v584_v59  ;;  %v663_v58 = vld [vmem:[#allocation6 + $0x370] sm:$0xff] }
  0xc4   :  { %854 = vmatpush.msrb.mxu2 %v599_v60  ;;  %v647_v59 = vld [vmem:[#allocation6 + $0x2f0] sm:$0xff]  ;;  %v625_v60 = vld [vmem:[#allocation6 + $0x240] sm:$0xff] }
  0xc5   :  { %874 = vmatpush.msrb.mxu3 %v615_v62  ;;  %834 = vmatpush.msrb.mxu1 %v583_v63  ;;  %v662_v62 = vld [vmem:[#allocation6 + $0x368] sm:$0xff] }
  0xc6   :  { %855 = vmatpush.msrb.mxu2 %v598_v0  ;;  %v646_v63 = vld [vmem:[#allocation6 + $0x2e8] sm:$0xff]  ;;  %v624_v0 = vld [vmem:[#allocation6 + $0x238] sm:$0xff]  ;;  %900 = vmatpush.msra.mxu0 %v625_v60 }
  0xc7   :  { %875 = vmatpush.msrb.mxu3 %v614_v2  ;;  %835 = vmatpush.msrb.mxu1 %v582_v3  ;;  %v661_v2 = vld [vmem:[#allocation6 + $0x360] sm:$0xff] }
  0xc8   :  { %856 = vmatpush.msrb.mxu2 %v597_v4  ;;  %v645_v3 = vld [vmem:[#allocation6 + $0x2e0] sm:$0xff]  ;;  %v623_v4 = vld [vmem:[#allocation6 + $0x230] sm:$0xff]  ;;  %901 = vmatpush.msra.mxu0 %v624_v0 }
  0xc9   :  { %1257 = vmatmul.msk.f32.vlgmr.msra.gmra.mxu1 %vm182_vm2, %v1458_v40  ;;  %1259 = vmatmul.msk.f32.vlgmr.msra.gmra.mxu2 %vm182_vm2, %v1458_v40 }
  0xca   :  { %1261 = vmatmul.msk.f32.vlgmr.msra.gmra.mxu3 %vm182_vm2, %v1458_v40  ;;  %836 = vmatpush.msrb.mxu1 %v581_v6  ;;  %v588_v40 = vld [vmem:[#allocation6 + $0x118] sm:$0xff] }
  0xcb   :  { %876 = vmatpush.msrb.mxu3 %v613_v7  ;;  %857 = vmatpush.msrb.mxu2 %v596_v8  ;;  %v660_v6 = vld [vmem:[#allocation6 + $0x358] sm:$0xff]  ;;  %v622_v8 = vld [vmem:[#allocation6 + $0x228] sm:$0xff] }
  0xcc   :  { %837 = vmatpush.msrb.mxu1 %v580_v9  ;;  %v644_v7 = vld [vmem:[#allocation6 + $0x2d8] sm:$0xff]  ;;  %902 = vmatpush.msra.mxu0 %v623_v4 }
  0xcd   :  { %877 = vmatpush.msrb.mxu3 %v612_v11  ;;  %858 = vmatpush.msrb.mxu2 %v595_v12  ;;  %v676_v9 = vld [vmem:[#allocation6 + $0x3d8] sm:$0xff]  ;;  %v643_v11 = vld [vmem:[#allocation6 + $0x2d0] sm:$0xff]  ;;  %v621_v12 = vld [vmem:[#allocation6 + $0x220] sm:$0xff] }
  0xce   :  { %838 = vmatpush.msrb.mxu1 %v579_v13  ;;  %v675_v13 = vld [vmem:[#allocation6 + $0x3d0] sm:$0xff]  ;;  %903 = vmatpush.msra.mxu0 %v622_v8  ;;  %v728_v4 = vld [vmem:[#allocation6 + $0x578] sm:$0xff] }
  0xcf   :  { %878 = vmatpush.msrb.mxu3 %v611_v15  ;;  %859 = vmatpush.msrb.mxu2 %v594_v16  ;;  %v642_v15 = vld [vmem:[#allocation6 + $0x2c8] sm:$0xff]  ;;  %v620_v16 = vld [vmem:[#allocation6 + $0x218] sm:$0xff] }
  0xd0   :  { %839 = vmatpush.msrb.mxu1 %v578_v17  ;;  %v674_v17 = vld [vmem:[#allocation6 + $0x3c8] sm:$0xff]  ;;  %904 = vmatpush.msra.mxu0 %v621_v12  ;;  %v743_v12 = vld [vmem:[#allocation6 + $0x5f0] sm:$0xff] }
  0xd1   :  { %879 = vmatpush.msrb.mxu3 %v610_v19  ;;  %860 = vmatpush.msrb.mxu2 %v593_v20  ;;  %v641_v19 = vld [vmem:[#allocation6 + $0x2c0] sm:$0xff] }
  0xd2   :  { %840 = vmatpush.msrb.mxu1 %v577_v21  ;;  %v673_v20 = vld [vmem:[#allocation6 + $0x3c0] sm:$0xff]  ;;  %v656_v21 = vld [vmem:[#allocation6 + $0x338] sm:$0xff]  ;;  %905 = vmatpush.msra.mxu0 %v620_v16  ;;  %v711_v16 = vld [vmem:[#allocation6 + $0x4f0] sm:$0xff] }
  0xd3   :  { %880 = vmatpush.msrb.mxu3 %v609_v23  ;;  %861 = vmatpush.msrb.mxu2 %v592_v24  ;;  %v672_v23 = vld [vmem:[#allocation6 + $0x3b8] sm:$0xff]  ;;  %v655_v24 = vld [vmem:[#allocation6 + $0x330] sm:$0xff] }
  0xd4   :  { %841 = vmatpush.msrb.mxu1 %v576_v25  ;;  %v671_v25 = vld [vmem:[#allocation6 + $0x3b0] sm:$0xff]  ;;  %906 = vmatpush.msra.mxu0 %v619_v26 }
  0xd5   :  { %881 = vmatpush.msrb.mxu3 %v608_v27  ;;  %862 = vmatpush.msrb.mxu2 %v591_v28  ;;  %v639_v27 = vld [vmem:[#allocation6 + $0x2b0] sm:$0xff]  ;;  %v654_v28 = vld [vmem:[#allocation6 + $0x328] sm:$0xff] }
  0xd6   :  { %842 = vmatpush.msrb.mxu1 %v575_v29  ;;  %v670_v29 = vld [vmem:[#allocation6 + $0x3a8] sm:$0xff]  ;;  %907 = vmatpush.msra.mxu0 %v618_v30  ;;  %v689_v30 = vld [vmem:[#allocation6 + $0x440] sm:$0xff] }
  0xd7   :  { %882 = vmatpush.msrb.mxu3 %v607_v31  ;;  %863 = vmatpush.msrb.mxu2 %v590_v32  ;;  %v638_v31 = vld [vmem:[#allocation6 + $0x2a8] sm:$0xff]  ;;  %v653_v32 = vld [vmem:[#allocation6 + $0x320] sm:$0xff] }
  0xd8   :  { %843 = vmatpush.msrb.mxu1 %v574_v33  ;;  %v669_v33 = vld [vmem:[#allocation6 + $0x3a0] sm:$0xff]  ;;  %908 = vmatpush.msra.mxu0 %v617_v34 }
  0xd9   :  { %883 = vmatpush.msrb.mxu3 %v606_v35  ;;  %864 = vmatpush.msrb.mxu2 %v589_v36  ;;  %v637_v35 = vld [vmem:[#allocation6 + $0x2a0] sm:$0xff]  ;;  %v652_v36 = vld [vmem:[#allocation6 + $0x318] sm:$0xff] }
  0xda   :  { %844 = vmatpush.msrb.mxu1 %v573_v37  ;;  %v668_v37 = vld [vmem:[#allocation6 + $0x398] sm:$0xff] }
  0xdb   :  { %884 = vmatpush.msrb.mxu3 %v605_v39  ;;  %865 = vmatpush.msrb.mxu2 %v588_v40  ;;  %v651_v39 = vld [vmem:[#allocation6 + $0x310] sm:$0xff] }
  0xdc   :  { %845 = vmatpush.msrb.mxu1 %v572_v41  ;;  %v667_v40 = vld [vmem:[#allocation6 + $0x390] sm:$0xff] }
  0xdd   :  { %885 = vmatpush.msrb.mxu3 %v604_v43  ;;  %866 = vmatpush.msrb.mxu2 %v587_v44  ;;  %v635_v41 = vld [vmem:[#allocation6 + $0x290] sm:$0xff]  ;;  %v666_v43 = vld [vmem:[#allocation6 + $0x388] sm:$0xff] }
  0xde   :  { %846 = vmatpush.msrb.mxu1 %v571_v45  ;;  %v634_v44 = vld [vmem:[#allocation6 + $0x288] sm:$0xff]  ;;  %v649_v45 = vld [vmem:[#allocation6 + $0x300] sm:$0xff] }
  0xdf   :  { %886 = vmatpush.msrb.mxu3 %v603_v47  ;;  %867 = vmatpush.msrb.mxu2 %v586_v48  ;;  %v633_v47 = vld [vmem:[#allocation6 + $0x280] sm:$0xff]  ;;  %v1504_v48 = vld [vmem:[%s1589_s2] sm:$0xff] }
  0xe0   :  { %847 = vmatpush.msrb.mxu1 %v570_v49  ;;  %v107_v49 = vperm.slane %v1504_v48, 0  ;;  %v111_v8 = vperm.slane %v1504_v48, 4  ;;  %v113_v34 = vperm.slane %v1504_v48, 6 }
  0xe1   :  { %887 = vmatpush.msrb.mxu3 %v602_v51  ;;  %868 = vmatpush.msrb.mxu2 %v585_v52 }
  0xe2   :  { %848 = vmatpush.msrb.mxu1 %v569_v54  ;;  %v109_v54 = vperm.slane %v1504_v48, 2 }
  0xe3   :  { %933 = vmatpush.msra.mxu2 %v664_v53  ;;  %888 = vmatpush.msrb.mxu3 %v601_v55  ;;  %v696_v53 = vld [vmem:[#allocation6 + $0x478] sm:$0xff]  ;;  %v110_v55 = vperm.slane %v1504_v48, 3 }
  0xe4   :  { %913 = vmatpush.msra.mxu1 %v648_v56  ;;  %v695_v56 = vld [vmem:[#allocation6 + $0x470] sm:$0xff] }
  0xe5   :  { %953 = vmatpush.msra.mxu3 %v680_v57  ;;  %934 = vmatpush.msra.mxu2 %v663_v58  ;;  %v108_v57 = vperm.slane %v1504_v48, 1 }
  0xe6   :  { %914 = vmatpush.msra.mxu1 %v647_v59 }
  0xe7   :  { %954 = vmatpush.msra.mxu3 %v679_v61  ;;  %935 = vmatpush.msra.mxu2 %v662_v62  ;;  %v694_v61 = vld [vmem:[#allocation6 + $0x468] sm:$0xff] }
  0xe8   :  { %915 = vmatpush.msra.mxu1 %v646_v63 }
  0xe9   :  { %955 = vmatpush.msra.mxu3 %v678_v1  ;;  %936 = vmatpush.msra.mxu2 %v661_v2  ;;  %v693_v2 = vld [vmem:[#allocation6 + $0x460] sm:$0xff] }
  0xea   :  { %916 = vmatpush.msra.mxu1 %v645_v3 }
  0xeb   :  { %956 = vmatpush.msra.mxu3 %v677_v5  ;;  %937 = vmatpush.msra.mxu2 %v660_v6  ;;  %v744_v5 = vld [vmem:[#allocation6 + $0x5f8] sm:$0xff] }
  0xec   :  { %917 = vmatpush.msra.mxu1 %v644_v7  ;;  %v692_v7 = vld [vmem:[#allocation6 + $0x458] sm:$0xff] }
  0xed   :  { %957 = vmatpush.msra.mxu3 %v676_v9  ;;  %938 = vmatpush.msra.mxu2 %v659_v10  ;;  %v712_v9 = vld [vmem:[#allocation6 + $0x4f8] sm:$0xff]  ;;  %v727_v10 = vld [vmem:[#allocation6 + $0x570] sm:$0xff] }
  0xee   :  { %918 = vmatpush.msra.mxu1 %v643_v11  ;;  %v114_v11 = vperm.slane %v1504_v48, 7 }
  0xef   :  { %958 = vmatpush.msra.mxu3 %v675_v13  ;;  %939 = vmatpush.msra.mxu2 %v658_v14  ;;  %v691_v13 = vld [vmem:[#allocation6 + $0x450] sm:$0xff]  ;;  %v112_v14 = vperm.slane %v1504_v48, 5 }
  0xf0   :  { %919 = vmatpush.msra.mxu1 %v642_v15 }
  0xf1   :  { %959 = vmatpush.msra.mxu3 %v674_v17  ;;  %940 = vmatpush.msra.mxu2 %v657_v18  ;;  %v726_v17 = vld [vmem:[#allocation6 + $0x568] sm:$0xff] }
  0xf2   :  { %920 = vmatpush.msra.mxu1 %v641_v19 }
  0xf3   :  { %960 = vmatpush.msra.mxu3 %v673_v20  ;;  %941 = vmatpush.msra.mxu2 %v656_v21  ;;  %v742_v20 = vld [vmem:[#allocation6 + $0x5e8] sm:$0xff] }
  0xf4   :  { %921 = vmatpush.msra.mxu1 %v640_v22  ;;  %v690_v21 = vld [vmem:[#allocation6 + $0x448] sm:$0xff] }
  0xf5   :  { %961 = vmatpush.msra.mxu3 %v672_v23  ;;  %942 = vmatpush.msra.mxu2 %v655_v24  ;;  %v710_v24 = vld [vmem:[#allocation6 + $0x4e8] sm:$0xff] }
  0xf6   :  { %922 = vmatpush.msra.mxu1 %v639_v27 }
  0xf7   :  { %962 = vmatpush.msra.mxu3 %v671_v25  ;;  %943 = vmatpush.msra.mxu2 %v654_v28  ;;  %v725_v25 = vld [vmem:[#allocation6 + $0x560] sm:$0xff] }
  0xf8   :  { %923 = vmatpush.msra.mxu1 %v638_v31  ;;  %v741_v28 = vld [vmem:[#allocation6 + $0x5e0] sm:$0xff] }
  0xf9   :  { %963 = vmatpush.msra.mxu3 %v670_v29  ;;  %944 = vmatpush.msra.mxu2 %v653_v32  ;;  %v709_v32 = vld [vmem:[#allocation6 + $0x4e0] sm:$0xff] }
  0xfa   :  { %924 = vmatpush.msra.mxu1 %v637_v35  ;;  %v740_v35 = vld [vmem:[#allocation6 + $0x5d8] sm:$0xff] }
  0xfb   :  { %964 = vmatpush.msra.mxu3 %v669_v33  ;;  %945 = vmatpush.msra.mxu2 %v652_v36  ;;  %v724_v33 = vld [vmem:[#allocation6 + $0x558] sm:$0xff] }
  0xfc   :  { %925 = vmatpush.msra.mxu1 %v636_v38  ;;  %v688_v36 = vld [vmem:[#allocation6 + $0x438] sm:$0xff]  ;;  %v723_v38 = vld [vmem:[#allocation6 + $0x550] sm:$0xff] }
  0xfd   :  { %965 = vmatpush.msra.mxu3 %v668_v37  ;;  %946 = vmatpush.msra.mxu2 %v651_v39  ;;  %v708_v37 = vld [vmem:[#allocation6 + $0x4d8] sm:$0xff]  ;;  %v739_v39 = vld [vmem:[#allocation6 + $0x5d0] sm:$0xff] }
  0xfe   :  { %926 = vmatpush.msra.mxu1 %v635_v41 }
  0xff   :  { %966 = vmatpush.msra.mxu3 %v667_v40  ;;  %947 = vmatpush.msra.mxu2 %v650_v42  ;;  %v687_v42 = vld [vmem:[#allocation6 + $0x430] sm:$0xff] }
 0x100   :  { %927 = vmatpush.msra.mxu1 %v634_v44  ;;  %v722_v44 = vld [vmem:[#allocation6 + $0x548] sm:$0xff] }
 0x101   :  { %967 = vmatpush.msra.mxu3 %v666_v43  ;;  %948 = vmatpush.msra.mxu2 %v649_v45  ;;  %v707_v43 = vld [vmem:[#allocation6 + $0x4d0] sm:$0xff]  ;;  %v738_v45 = vld [vmem:[#allocation6 + $0x5c8] sm:$0xff] }
 0x102   :  { %928 = vmatpush.msra.mxu1 %v633_v47  ;;  %v706_v47 = vld [vmem:[#allocation6 + $0x4c8] sm:$0xff] }
 0x103   :  { %968 = vmatpush.msra.mxu3 %v665_v46  ;;  %v686_v46 = vld [vmem:[#allocation6 + $0x428] sm:$0xff] }
 0x126   :  { %v234_v50 = vpop.f32.mrf.mxu1 }
 0x127   :  { %v235_v51 = vadd.f32 %v234_v50, %v107_v49  ;;  %v721_v49 = vld [vmem:[#allocation6 + $0x540] sm:$0xff] }
 0x128   :  { %v737_v50 = vld [vmem:[#allocation6 + $0x5c0] sm:$0xff] }
 0x129   :  { %v537_v52 = vmax.f32 %v235_v51, 0.0  ;;  %v685_v51 = vld [vmem:[#allocation6 + $0x420] sm:$0xff] }
 0x12b   :  { %829 = vmatmul.f32.vlgmr.msrb.gmra.mxu0 %v537_v52 }
 0x12c   :  { %973 = vmatpush.msrb.mxu0 %v696_v53  ;;  %v274_v58 = vpop.f32.mrf.mxu2  ;;  %v705_v53 = vld [vmem:[#allocation6 + $0x4c0] sm:$0xff] }
 0x12d   :  { %v275_v59 = vadd.f32 %v274_v58, %v109_v54  ;;  %v294_v60 = vpop.f32.mrf.mxu3  ;;  %v720_v54 = vld [vmem:[#allocation6 + $0x538] sm:$0xff] }
 0x12e   :  { %v295_v62 = vadd.f32 %v294_v60, %v110_v55  ;;  %974 = vmatpush.msrb.mxu0 %v695_v56  ;;  %v254_v63 = vpop.f32.mrf.mxu1  ;;  %v1517_v55 = vld [vmem:[%s1589_s2 + $0x8] sm:$0xff]  ;;  %v719_v60 = vld [vmem:[#allocation6 + $0x530] sm:$0xff] }
 0x12f   :  { %v539_v0 = vmax.f32 %v275_v59, 0.0  ;;  %v255_v1 = vadd.f32 %v254_v63, %v108_v57  ;;  %v736_v56 = vld [vmem:[#allocation6 + $0x5b8] sm:$0xff]  ;;  %v115_v58 = vperm.slane %v1517_v55, 0  ;;  %v703_v63 = vld [vmem:[#allocation6 + $0x4b0] sm:$0xff] }
 0x130   :  { %v540_v3 = vmax.f32 %v295_v62, 0.0  ;;  %975 = vmatpush.msrb.mxu0 %v694_v61  ;;  %v684_v57 = vld [vmem:[#allocation6 + $0x418] sm:$0xff]  ;;  %v735_v61 = vld [vmem:[#allocation6 + $0x5b0] sm:$0xff] }
 0x131   :  { %v538_v6 = vmax.f32 %v255_v1, 0.0  ;;  %869 = vmatmul.f32.vlgmr.msrb.gmra.mxu2 %v539_v0  ;;  %v704_v59 = vld [vmem:[#allocation6 + $0x4b8] sm:$0xff]  ;;  %v683_v62 = vld [vmem:[#allocation6 + $0x410] sm:$0xff]  ;;  %v718_v0 = vld [vmem:[#allocation6 + $0x528] sm:$0xff] }
 0x132   :  { %889 = vmatmul.f32.vlgmr.msrb.gmra.mxu3 %v540_v3  ;;  %976 = vmatpush.msrb.mxu0 %v693_v2  ;;  %v734_v1 = vld [vmem:[#allocation6 + $0x5a8] sm:$0xff] }
 0x133   :  { %1013 = vmatpush.msrb.mxu2 %v728_v4  ;;  %1033 = vmatpush.msrb.mxu3 %v744_v5  ;;  %v682_v2 = vld [vmem:[#allocation6 + $0x408] sm:$0xff]  ;;  %v717_v5 = vld [vmem:[#allocation6 + $0x520] sm:$0xff] }
 0x134   :  { %849 = vmatmul.f32.vlgmr.msrb.gmra.mxu1 %v538_v6  ;;  %977 = vmatpush.msrb.mxu0 %v692_v7  ;;  %v314_v15 = vpop.f32.mrf.mxu2  ;;  %v702_v4 = vld [vmem:[#allocation6 + $0x4a8] sm:$0xff]  ;;  %v733_v6 = vld [vmem:[#allocation6 + $0x5a0] sm:$0xff] }
 0x135   :  { %993 = vmatpush.msrb.mxu1 %v712_v9  ;;  %1014 = vmatpush.msrb.mxu2 %v727_v10  ;;  %v315_v18 = vadd.f32 %v314_v15, %v111_v8  ;;  %v374_v19 = vpop.f32.mrf.mxu3  ;;  %v681_v7 = vld [vmem:[#allocation6 + $0x400] sm:$0xff]  ;;  %v716_v9 = vld [vmem:[#allocation6 + $0x518] sm:$0xff]  ;;  %v117_v10 = vperm.slane %v1517_v55, 2 }
 0x136   :  { %1034 = vmatpush.msrb.mxu3 %v743_v12  ;;  %v375_v22 = vadd.f32 %v374_v19, %v114_v11  ;;  %978 = vmatpush.msrb.mxu0 %v691_v13  ;;  %v334_v23 = vpop.f32.mrf.mxu1  ;;  %v701_v8 = vld [vmem:[#allocation6 + $0x4a0] sm:$0xff]  ;;  %v118_v11 = vperm.slane %v1517_v55, 3  ;;  %v732_v12 = vld [vmem:[#allocation6 + $0x598] sm:$0xff]  ;;  %v731_v19 = vld [vmem:[#allocation6 + $0x590] sm:$0xff] }
 0x137   :  { %v541_v26 = vmax.f32 %v315_v18, 0.0  ;;  %994 = vmatpush.msrb.mxu1 %v711_v16  ;;  %1015 = vmatpush.msrb.mxu2 %v726_v17  ;;  %v335_v27 = vadd.f32 %v334_v23, %v112_v14  ;;  %v760_v16 = vld [vmem:[#allocation6 + $0x678] sm:$0xff]  ;;  %v715_v18 = vld [vmem:[#allocation6 + $0x510] sm:$0xff] }
 0x138   :  { %v544_v29 = vmax.f32 %v375_v22, 0.0  ;;  %1035 = vmatpush.msrb.mxu3 %v742_v20  ;;  %979 = vmatpush.msrb.mxu0 %v690_v21  ;;  %v700_v17 = vld [vmem:[#allocation6 + $0x498] sm:$0xff]  ;;  %v116_v20 = vperm.slane %v1517_v55, 1  ;;  %v759_v21 = vld [vmem:[#allocation6 + $0x670] sm:$0xff] }
 0x139   :  { %v542_v31 = vmax.f32 %v335_v27, 0.0  ;;  %995 = vmatpush.msrb.mxu1 %v710_v24  ;;  %1016 = vmatpush.msrb.mxu2 %v725_v25  ;;  %v699_v22 = vld [vmem:[#allocation6 + $0x490] sm:$0xff]  ;;  %v730_v27 = vld [vmem:[#allocation6 + $0x588] sm:$0xff] }
 0x13a   :  { %1036 = vmatpush.msrb.mxu3 %v741_v28  ;;  %909 = vmatmul.f32.vlgmr.msra.gmra.mxu0 %v541_v26  ;;  %v714_v26 = vld [vmem:[#allocation6 + $0x508] sm:$0xff] }
 0x13b   :  { %969 = vmatmul.f32.vlgmr.msra.gmra.mxu3 %v544_v29  ;;  %980 = vmatpush.msrb.mxu0 %v689_v30  ;;  %v758_v28 = vld [vmem:[#allocation6 + $0x668] sm:$0xff]  ;;  %v713_v30 = vld [vmem:[#allocation6 + $0x500] sm:$0xff] }
 0x13c   :  { %996 = vmatpush.msrb.mxu1 %v709_v32  ;;  %1017 = vmatpush.msrb.mxu2 %v724_v33  ;;  %v354_v40 = vpop.f32.mrf.mxu2  ;;  %v698_v29 = vld [vmem:[#allocation6 + $0x488] sm:$0xff] }
 0x13d   :  { %1037 = vmatpush.msrb.mxu3 %v740_v35  ;;  %929 = vmatmul.f32.vlgmr.msra.gmra.mxu1 %v542_v31  ;;  %v355_v41 = vadd.f32 %v354_v40, %v113_v34  ;;  %v394_v52 = vpop.f32.mrf.mxu3  ;;  %v729_v31 = vld [vmem:[#allocation6 + $0x580] sm:$0xff] }
 0x13e   :  { %981 = vmatpush.msrb.mxu0 %v688_v36  ;;  %997 = vmatpush.msrb.mxu1 %v708_v37  ;;  %v395_v3 = vadd.f32 %v394_v52, %v115_v58  ;;  %v414_v23 = vpop.f32.mrf.mxu1  ;;  %v757_v35 = vld [vmem:[#allocation6 + $0x660] sm:$0xff]  ;;  %v792_v36 = vld [vmem:[#allocation6 + $0x778] sm:$0xff] }
 0x13f   :  { %1018 = vmatpush.msrb.mxu2 %v723_v38  ;;  %1038 = vmatpush.msrb.mxu3 %v739_v39  ;;  %v543_v48 = vmax.f32 %v355_v41, 0.0  ;;  %v415_v32 = vadd.f32 %v414_v23, %v116_v20  ;;  %v808_v37 = vld [vmem:[#allocation6 + $0x7f8] sm:$0xff]  ;;  %v697_v38 = vld [vmem:[#allocation6 + $0x480] sm:$0xff] }
 0x140   :  { %982 = vmatpush.msrb.mxu0 %v687_v42  ;;  %998 = vmatpush.msrb.mxu1 %v707_v43  ;;  %v545_v13 = vmax.f32 %v395_v3, 0.0  ;;  %v756_v39 = vld [vmem:[#allocation6 + $0x658] sm:$0xff]  ;;  %v791_v42 = vld [vmem:[#allocation6 + $0x770] sm:$0xff]  ;;  %v753_v52 = vld [vmem:[#allocation6 + $0x640] sm:$0xff] }
 0x141   :  { %1019 = vmatpush.msrb.mxu2 %v722_v44  ;;  %1039 = vmatpush.msrb.mxu3 %v738_v45  ;;  %v546_v40 = vmax.f32 %v415_v32, 0.0  ;;  %v776_v41 = vld [vmem:[#allocation6 + $0x6f8] sm:$0xff]  ;;  %v807_v43 = vld [vmem:[#allocation6 + $0x7f0] sm:$0xff]  ;;  %v785_v3 = vld [vmem:[#allocation6 + $0x740] sm:$0xff]  ;;  %v120_v32 = vperm.slane %v1517_v55, 5 }
 0x142   :  { %983 = vmatpush.msrb.mxu0 %v686_v46  ;;  %999 = vmatpush.msrb.mxu1 %v706_v47  ;;  %v755_v44 = vld [vmem:[#allocation6 + $0x650] sm:$0xff]  ;;  %v790_v46 = vld [vmem:[#allocation6 + $0x768] sm:$0xff]  ;;  %v772_v58 = vld [vmem:[#allocation6 + $0x6d8] sm:$0xff] }
 0x143   :  { %1020 = vmatpush.msrb.mxu2 %v721_v49  ;;  %1040 = vmatpush.msrb.mxu3 %v737_v50  ;;  %v775_v45 = vld [vmem:[#allocation6 + $0x6f0] sm:$0xff]  ;;  %v806_v47 = vld [vmem:[#allocation6 + $0x7e8] sm:$0xff]  ;;  %v789_v50 = vld [vmem:[#allocation6 + $0x760] sm:$0xff] }
 0x144   :  { %949 = vmatmul.f32.vlgmr.msra.gmra.mxu2 %v543_v48  ;;  %984 = vmatpush.msrb.mxu0 %v685_v51  ;;  %v434_v14 = vpop.f32.mrf.mxu2  ;;  %v754_v48 = vld [vmem:[#allocation6 + $0x648] sm:$0xff]  ;;  %v805_v51 = vld [vmem:[#allocation6 + $0x7e0] sm:$0xff] }
 0x145   :  { %1000 = vmatpush.msrb.mxu1 %v705_v53  ;;  %1021 = vmatpush.msrb.mxu2 %v720_v54  ;;  %v454_v15 = vpop.f32.mrf.mxu3  ;;  %v435_v24 = vadd.f32 %v434_v14, %v117_v10  ;;  %v774_v49 = vld [vmem:[#allocation6 + $0x6e8] sm:$0xff]  ;;  %v773_v53 = vld [vmem:[#allocation6 + $0x6e0] sm:$0xff]  ;;  %v788_v54 = vld [vmem:[#allocation6 + $0x758] sm:$0xff]  ;;  %v119_v10 = vperm.slane %v1517_v55, 4 }
 0x146   :  { %1041 = vmatpush.msrb.mxu3 %v736_v56  ;;  %985 = vmatpush.msrb.mxu0 %v684_v57  ;;  %v455_v25 = vadd.f32 %v454_v15, %v118_v11  ;;  %v804_v56 = vld [vmem:[#allocation6 + $0x7d8] sm:$0xff]  ;;  %v799_v14 = vld [vmem:[#allocation6 + $0x7b0] sm:$0xff]  ;;  %v797_v23 = vld [vmem:[#allocation6 + $0x7a0] sm:$0xff] }
 0x147   :  { %1001 = vmatpush.msrb.mxu1 %v704_v59  ;;  %1022 = vmatpush.msrb.mxu2 %v719_v60  ;;  %v547_v33 = vmax.f32 %v435_v24, 0.0  ;;  %v752_v57 = vld [vmem:[#allocation6 + $0x638] sm:$0xff]  ;;  %v787_v59 = vld [vmem:[#allocation6 + $0x750] sm:$0xff]  ;;  %v745_v24 = vld [vmem:[#allocation6 + $0x600] sm:$0xff] }
 0x148   :  { %1042 = vmatpush.msrb.mxu3 %v735_v61  ;;  %986 = vmatpush.msrb.mxu0 %v683_v62  ;;  %v548_v34 = vmax.f32 %v455_v25, 0.0  ;;  %v803_v60 = vld [vmem:[#allocation6 + $0x7d0] sm:$0xff]  ;;  %v768_v11 = vld [vmem:[#allocation6 + $0x6b8] sm:$0xff]  ;;  %v121_v25 = vperm.slane %v1517_v55, 6 }
 0x149   :  { %1002 = vmatpush.msrb.mxu1 %v703_v63  ;;  %1023 = vmatpush.msrb.mxu2 %v718_v0  ;;  %v751_v61 = vld [vmem:[#allocation6 + $0x630] sm:$0xff]  ;;  %v786_v63 = vld [vmem:[#allocation6 + $0x748] sm:$0xff] }
 0x14a   :  { %1043 = vmatpush.msrb.mxu3 %v734_v1  ;;  %987 = vmatpush.msrb.mxu0 %v682_v2  ;;  %v771_v62 = vld [vmem:[#allocation6 + $0x6d0] sm:$0xff]  ;;  %v802_v0 = vld [vmem:[#allocation6 + $0x7c8] sm:$0xff] }
 0x14b   :  { %1003 = vmatpush.msrb.mxu1 %v702_v4  ;;  %1024 = vmatpush.msrb.mxu2 %v717_v5  ;;  %v750_v1 = vld [vmem:[#allocation6 + $0x628] sm:$0xff]  ;;  %v801_v4 = vld [vmem:[#allocation6 + $0x7c0] sm:$0xff]  ;;  %v747_v15 = vld [vmem:[#allocation6 + $0x610] sm:$0xff] }
 0x14c   :  { %1044 = vmatpush.msrb.mxu3 %v733_v6  ;;  %988 = vmatpush.msrb.mxu0 %v681_v7  ;;  %v770_v2 = vld [vmem:[#allocation6 + $0x6c8] sm:$0xff]  ;;  %v749_v5 = vld [vmem:[#allocation6 + $0x620] sm:$0xff]  ;;  %v784_v7 = vld [vmem:[#allocation6 + $0x738] sm:$0xff] }
 0x14d   :  { %1004 = vmatpush.msrb.mxu1 %v701_v8  ;;  %1025 = vmatpush.msrb.mxu2 %v716_v9  ;;  %v769_v6 = vld [vmem:[#allocation6 + $0x6c0] sm:$0xff]  ;;  %v800_v8 = vld [vmem:[#allocation6 + $0x7b8] sm:$0xff] }
 0x14e   :  { %1045 = vmatpush.msrb.mxu3 %v732_v12  ;;  %989 = vmatmul.f32.vlgmr.msrb.gmra.mxu0 %v545_v13  ;;  %v748_v9 = vld [vmem:[#allocation6 + $0x618] sm:$0xff]  ;;  %v783_v12 = vld [vmem:[#allocation6 + $0x730] sm:$0xff]  ;;  %v474_v13 = vpop.f32.mrf.mxu0 }
 0x14f   :  { %1053 = vmatpush.msra.mxu0 %v760_v16  ;;  %1005 = vmatpush.msrb.mxu1 %v700_v17  ;;  %v767_v16 = vld [vmem:[#allocation6 + $0x6b0] sm:$0xff]  ;;  %v782_v17 = vld [vmem:[#allocation6 + $0x728] sm:$0xff]  ;;  %v475_v20 = vadd.f32 %v474_v13, %v119_v10 }
 0x150   :  { %1026 = vmatpush.msrb.mxu2 %v715_v18  ;;  %1046 = vmatpush.msrb.mxu3 %v731_v19  ;;  %v798_v18 = vld [vmem:[#allocation6 + $0x7a8] sm:$0xff]  ;;  %v1161_v13 = vld [vmem:[%s1592_s5 + $0x40] sm:$0xff] }
 0x151   :  { %1054 = vmatpush.msra.mxu0 %v759_v21  ;;  %1006 = vmatpush.msrb.mxu1 %v699_v22  ;;  %v746_v19 = vld [vmem:[#allocation6 + $0x608] sm:$0xff]  ;;  %v781_v22 = vld [vmem:[#allocation6 + $0x720] sm:$0xff] }
 0x152   :  { %1027 = vmatpush.msrb.mxu2 %v714_v26  ;;  %1047 = vmatpush.msrb.mxu3 %v730_v27  ;;  %v766_v21 = vld [vmem:[#allocation6 + $0x6a8] sm:$0xff]  ;;  %v765_v26 = vld [vmem:[#allocation6 + $0x6a0] sm:$0xff]  ;;  %v780_v27 = vld [vmem:[#allocation6 + $0x718] sm:$0xff] }
 0x153   :  { %1055 = vmatpush.msra.mxu0 %v758_v28  ;;  %1007 = vmatpush.msrb.mxu1 %v698_v29  ;;  %v514_v28 = vpop.f32.mrf.mxu2  ;;  %v122_v29 = vperm.slane %v1517_v55, 7  ;;  %v762_v55 = vld [vmem:[#allocation6 + $0x688] sm:$0xff] }
 0x154   :  { %1028 = vmatpush.msrb.mxu2 %v713_v30  ;;  %1048 = vmatpush.msrb.mxu3 %v729_v31  ;;  %v796_v30 = vld [vmem:[#allocation6 + $0x798] sm:$0xff]  ;;  %v549_v31 = vmax.f32 %v475_v20, 0.0 }
 0x155   :  { %1029 = vmatmul.f32.vlgmr.msrb.gmra.mxu2 %v547_v33  ;;  %1049 = vmatmul.f32.vlgmr.msrb.gmra.mxu3 %v548_v34  ;;  %v534_v33 = vpop.f32.mrf.mxu3  ;;  %v764_v34 = vld [vmem:[#allocation6 + $0x698] sm:$0xff] }
 0x156   :  { %1056 = vmatpush.msra.mxu0 %v757_v35  ;;  %1093 = vmatpush.msra.mxu2 %v792_v36  ;;  %v779_v35 = vld [vmem:[#allocation6 + $0x710] sm:$0xff]  ;;  %v494_v36 = vpop.f32.mrf.mxu1 }
 0x157   :  { %1113 = vmatpush.msra.mxu3 %v808_v37  ;;  %1008 = vmatpush.msrb.mxu1 %v697_v38  ;;  %v795_v37 = vld [vmem:[#allocation6 + $0x790] sm:$0xff]  ;;  %v515_v38 = vadd.f32 %v514_v28, %v121_v25 }
 0x158   :  { %1009 = vmatmul.f32.vlgmr.msrb.gmra.mxu1 %v546_v40  ;;  %1057 = vmatpush.msra.mxu0 %v756_v39  ;;  %v763_v39 = vld [vmem:[#allocation6 + $0x690] sm:$0xff]  ;;  %v778_v40 = vld [vmem:[#allocation6 + $0x708] sm:$0xff] }
 0x159   :  { %1073 = vmatpush.msra.mxu1 %v776_v41  ;;  %1094 = vmatpush.msra.mxu2 %v791_v42  ;;  %v535_v41 = vadd.f32 %v534_v33, %v122_v29  ;;  %v794_v42 = vld [vmem:[#allocation6 + $0x788] sm:$0xff]  ;;  %v1154_v29 = vld [vmem:[%s1592_s5 + $0x8] sm:$0xff] }
 0x15a   :  { %1114 = vmatpush.msra.mxu3 %v807_v43  ;;  %1058 = vmatpush.msra.mxu0 %v755_v44  ;;  %v495_v43 = vadd.f32 %v494_v36, %v120_v32  ;;  %v777_v44 = vld [vmem:[#allocation6 + $0x700] sm:$0xff]  ;;  %v1153_v32 = vld [vmem:[%s1592_s5] sm:$0xff] }
 0x15b   :  { %1074 = vmatpush.msra.mxu1 %v775_v45  ;;  %1095 = vmatpush.msra.mxu2 %v790_v46  ;;  %v793_v45 = vld [vmem:[#allocation6 + $0x780] sm:$0xff]  ;;  %v551_v46 = vmax.f32 %v515_v38, 0.0 }
 0x15c   :  { %1115 = vmatpush.msra.mxu3 %v806_v47  ;;  %1059 = vmatpush.msra.mxu0 %v754_v48  ;;  %v761_v47 = vld [vmem:[#allocation6 + $0x680] sm:$0xff]  ;;  %v552_v48 = vmax.f32 %v535_v41, 0.0 }
 0x15d   :  { %1075 = vmatpush.msra.mxu1 %v774_v49  ;;  %1096 = vmatpush.msra.mxu2 %v789_v50  ;;  %v550_v49 = vmax.f32 %v495_v43, 0.0  ;;  %v1269_v50 = vld [vmem:[%s1591_s4] ss:$0 sm:$0xff] }
 0x15e   :  { %1116 = vmatpush.msra.mxu3 %v805_v51  ;;  %1060 = vmatpush.msra.mxu0 %v753_v52 }
 0x15f   :  { %1076 = vmatpush.msra.mxu1 %v773_v53  ;;  %1097 = vmatpush.msra.mxu2 %v788_v54 }
 0x160   :  { %1117 = vmatpush.msra.mxu3 %v804_v56  ;;  %1061 = vmatpush.msra.mxu0 %v752_v57 }
 0x161   :  { %1077 = vmatpush.msra.mxu1 %v772_v58  ;;  %1098 = vmatpush.msra.mxu2 %v787_v59 }
 0x162   :  { %1118 = vmatpush.msra.mxu3 %v803_v60  ;;  %1062 = vmatpush.msra.mxu0 %v751_v61  ;;  %v1168_v61 = vld [vmem:[%s1592_s5 + $0x78] sm:$0xff] }
 0x163   :  { %1078 = vmatpush.msra.mxu1 %v771_v62  ;;  %1099 = vmatpush.msra.mxu2 %v786_v63  ;;  %v1167_v63 = vld [vmem:[%s1592_s5 + $0x70] sm:$0xff] }
 0x164   :  { %1119 = vmatpush.msra.mxu3 %v802_v0  ;;  %1063 = vmatpush.msra.mxu0 %v750_v1 }
 0x165   :  { %1079 = vmatpush.msra.mxu1 %v770_v2  ;;  %1100 = vmatpush.msra.mxu2 %v785_v3  ;;  %v1166_v2 = vld [vmem:[%s1592_s5 + $0x68] sm:$0xff] }
 0x166   :  { %1120 = vmatpush.msra.mxu3 %v801_v4  ;;  %1064 = vmatpush.msra.mxu0 %v749_v5  ;;  %v1165_v4 = vld [vmem:[%s1592_s5 + $0x60] sm:$0xff] }
 0x167   :  { %1080 = vmatpush.msra.mxu1 %v769_v6  ;;  %1101 = vmatpush.msra.mxu2 %v784_v7  ;;  %v1164_v6 = vld [vmem:[%s1592_s5 + $0x58] sm:$0xff] }
 0x168   :  { %1121 = vmatpush.msra.mxu3 %v800_v8  ;;  %1065 = vmatpush.msra.mxu0 %v748_v9  ;;  %v1163_v8 = vld [vmem:[%s1592_s5 + $0x50] sm:$0xff] }
 0x169   :  { %1081 = vmatpush.msra.mxu1 %v768_v11  ;;  %1102 = vmatpush.msra.mxu2 %v783_v12  ;;  %v1162_v11 = vld [vmem:[%s1592_s5 + $0x48] sm:$0xff] }
 0x16a   :  { %1122 = vmatpush.msra.mxu3 %v799_v14  ;;  %1066 = vmatpush.msra.mxu0 %v747_v15  ;;  %v1160_v14 = vld [vmem:[%s1592_s5 + $0x38] sm:$0xff] }
 0x16b   :  { %1082 = vmatpush.msra.mxu1 %v767_v16  ;;  %1103 = vmatpush.msra.mxu2 %v782_v17  ;;  %v1159_v17 = vld [vmem:[%s1592_s5 + $0x30] sm:$0xff] }
 0x16c   :  { %1123 = vmatpush.msra.mxu3 %v798_v18  ;;  %1067 = vmatpush.msra.mxu0 %v746_v19  ;;  %v1158_v19 = vld [vmem:[%s1592_s5 + $0x28] sm:$0xff] }
 0x16d   :  { %1083 = vmatpush.msra.mxu1 %v766_v21  ;;  %1104 = vmatpush.msra.mxu2 %v781_v22  ;;  %v1157_v21 = vld [vmem:[%s1592_s5 + $0x20] sm:$0xff] }
 0x16e   :  { %1124 = vmatpush.msra.mxu3 %v797_v23  ;;  %1068 = vmatpush.msra.mxu0 %v745_v24  ;;  %v1156_v24 = vld [vmem:[%s1592_s5 + $0x18] sm:$0xff] }
 0x16f   :  { %1084 = vmatpush.msra.mxu1 %v765_v26  ;;  %1105 = vmatpush.msra.mxu2 %v780_v27  ;;  %v1155_v27 = vld [vmem:[%s1592_s5 + $0x10] sm:$0xff]  ;;  %s1384_s5 = smov [#allocation8]  }
 0x170   :  { %1125 = vmatpush.msra.mxu3 %v796_v30  ;;  %1069 = vmatmul.f32.vlgmr.msra.gmra.mxu0 %v549_v31  ;;  %s1199_s9 = sshll.u32 %s1384_s5, 4  ;;  %s1200_s9 = int_to_ptr.vmem [resolvable:$true] %s1199_s9 }
 0x171   :  { %1085 = vmatpush.msra.mxu1 %v764_v34  ;;  %1106 = vmatpush.msra.mxu2 %v779_v35 }
 0x172   :  { %1126 = vmatpush.msra.mxu3 %v795_v37  ;;  %1173 = vmatpush.msrb.mxu0 %v1168_v61 }
 0x173   :  { %1086 = vmatpush.msra.mxu1 %v763_v39  ;;  %1107 = vmatpush.msra.mxu2 %v778_v40 }
 0x174   :  { %1127 = vmatpush.msra.mxu3 %v794_v42  ;;  %1174 = vmatpush.msrb.mxu0 %v1167_v63 }
 0x175   :  { %1087 = vmatpush.msra.mxu1 %v762_v55  ;;  %1108 = vmatpush.msra.mxu2 %v777_v44 }
 0x176   :  { %1128 = vmatpush.msra.mxu3 %v793_v45  ;;  %1109 = vmatmul.f32.vlgmr.msra.gmra.mxu2 %v551_v46 }
 0x177   :  { %1129 = vmatmul.f32.vlgmr.msra.gmra.mxu3 %v552_v48  ;;  %1088 = vmatpush.msra.mxu1 %v761_v47 }
 0x178   :  { %1089 = vmatmul.f32.vlgmr.msra.gmra.mxu1 %v550_v49  ;;  %1175 = vmatpush.msrb.mxu0 %v1166_v2  ;;  %v1270_v49 = vld [vmem:[%s1593_s6] ss:$0 sm:$0xff] }
 0x17a   :  { %1176 = vmatpush.msrb.mxu0 %v1165_v4 }
 0x17c   :  { %1177 = vmatpush.msrb.mxu0 %v1164_v6 }
 0x17e   :  { %1178 = vmatpush.msrb.mxu0 %v1163_v8 }
 0x180   :  { %1179 = vmatpush.msrb.mxu0 %v1162_v11 }
 0x182   :  { %1180 = vmatpush.msrb.mxu0 %v1161_v13 }
 0x184   :  { %1181 = vmatpush.msrb.mxu0 %v1160_v14 }
 0x186   :  { %1182 = vmatpush.msrb.mxu0 %v1159_v17 }
 0x188   :  { %1183 = vmatpush.msrb.mxu0 %v1158_v19 }
 0x18a   :  { %1184 = vmatpush.msrb.mxu0 %v1157_v21 }
 0x18c   :  { %1185 = vmatpush.msrb.mxu0 %v1156_v24 }
 0x18e   :  { %1186 = vmatpush.msrb.mxu0 %v1155_v27 }
 0x190   :  { %1187 = vmatpush.msrb.mxu0 %v1154_v29 }
 0x192   :  { %1188 = vmatpush.msrb.mxu0 %v1153_v32 }
 0x1a8   :  { %v830_v51 = vpop.f32.mrf.mxu0 }
 0x1a9   :  { %v831_v53 = vadd.f32 %v1269_v50, %v830_v51 }
 0x1b1   :  { %v850_v52 = vpop.f32.mrf.mxu1 }
 0x1b2   :  { %v851_v56 = vadd.f32 %v850_v52, %v831_v53 }
 0x1b4   :  { %v870_v54 = vpop.f32.mrf.mxu2 }
 0x1b5   :  { %v871_v57 = vadd.f32 %v870_v54, %v851_v56  ;;  %v890_v58 = vpop.f32.mrf.mxu3 }
 0x1b7   :  { %v891_v59 = vadd.f32 %v890_v58, %v871_v57  ;;  %v910_v60 = vpop.f32.mrf.mxu0 }
 0x1b9   :  { %v911_v62 = vadd.f32 %v910_v60, %v891_v59 }
 0x1ba   :  { %v930_v0 = vpop.f32.mrf.mxu1 }
 0x1bb   :  { %v931_v3 = vadd.f32 %v930_v0, %v911_v62 }
 0x1be   :  { %v970_v7 = vpop.f32.mrf.mxu3 }
 0x1c7   :  { %v950_v1 = vpop.f32.mrf.mxu2 }
 0x1c8   :  { %v951_v5 = vadd.f32 %v950_v1, %v931_v3 }
 0x1ca   :  { %v971_v9 = vadd.f32 %v970_v7, %v951_v5 }
 0x1cb   :  { %v990_v10 = vpop.f32.mrf.mxu0 }
 0x1cc   :  { %v991_v15 = vadd.f32 %v990_v10, %v971_v9 }
 0x1d5   :  { %v1010_v12 = vpop.f32.mrf.mxu1 }
 0x1d6   :  { %v1011_v18 = vadd.f32 %v1010_v12, %v991_v15 }
 0x1d8   :  { %v1030_v16 = vpop.f32.mrf.mxu2  ;;  %v1050_v22 = vpop.f32.mrf.mxu3 }
 0x1d9   :  { %v1031_v20 = vadd.f32 %v1030_v16, %v1011_v18 }
 0x1db   :  { %v1051_v25 = vadd.f32 %v1050_v22, %v1031_v20 }
 0x1ed   :  { %v1070_v23 = vpop.f32.mrf.mxu0 }
 0x1ee   :  { %v1071_v28 = vadd.f32 %v1070_v23, %v1051_v25 }
 0x1f5   :  { %v1090_v26 = vpop.f32.mrf.mxu1 }
 0x1f6   :  { %v1091_v30 = vadd.f32 %v1090_v26, %v1071_v28 }
 0x1f9   :  { %v1110_v31 = vpop.f32.mrf.mxu2 }
 0x1fa   :  { %v1111_v33 = vadd.f32 %v1110_v31, %v1091_v30  ;;  %v1130_v34 = vpop.f32.mrf.mxu3 }
 0x1fc   :  { %v1131_v35 = vadd.f32 %v1130_v34, %v1111_v33 }
 0x1fe   :  { %v1133_v36 = vsub.f32 0.0, %v1131_v35 }
 0x200   :  { %v1134_v37 = vmul.f32 1.442695, %v1133_v36 }
 0x202   :  { %1271 = vpow2.f32 %v1134_v37 }
 0x208   :  { %v1272_v38 = vpop.eup %1271 }
 0x209   :  { %v1136_v39 = vadd.f32 1.0, %v1272_v38 }
 0x20b   :  { %1273 = vrcp.f32 %v1136_v39  ;;  %v1148_v43 = vand.u32 2147483648, %v1136_v39  ;;  %v1146_v44 = vand.u32 2147483647, %v1136_v39  ;;  %vm1142_vm4 = vweird.f32 %v1136_v39 }
 0x20d   :  { %v1149_v46 = vor.u32 1.1754944e-38, %v1148_v43  ;;  %vm1147_vm6 = vcmp.eq.f32.partialorder %v1146_v44, 8.507059e+37 }
 0x211   :  { %v1274_v40 = vpop.eup %1273 }
 0x212   :  { %v1138_v41 = vmul.f32 %v1274_v40, %v1136_v39  ;;  %vm1143_vm3 = vweird.f32 %v1274_v40 }
 0x213   :  { %vm1144_vm5 = vmor %vm1142_vm4, %vm1143_vm3 }
 0x214   :  { %v1139_v42 = vsub.f32 1.0, %v1138_v41 }
 0x216   :  { %v1140_v55 = vmul.f32 %v1274_v40, %v1139_v42 }
 0x218   :  { %v1141_v45 = vadd.f32 %v1274_v40, %v1140_v55 }
 0x21a   :  { %v1145_v47 = vsel %vm1144_vm5, %v1274_v40, %v1141_v45 }
 0x21b   :  { %v1150_v48 = vsel %vm1147_vm6, %v1149_v46, %v1145_v47 }
 0x21c   :  { %1189 = vmatmul.f32.vlgmr.msrb.gmra.mxu0 %v1150_v48  ;;  %1152 = vst [vmem:[#allocation8] sm:$0x3] %v1150_v48 }
 0x21d   :  { %1204 = dma.vmem_to_hbm [thread:$0]  %s1200_s9, 32, %s1202_s12, [#allocation5]  }
 0x299   :  { %v1190_v50 = vpop.f32.mrf.mxu0 }
 0x29a   :  { %v1191_v51 = vadd.f32 %v1270_v49, %v1190_v50 }
 0x29c   :  { %1193 = vst [vmem:[#allocation9] sm:$0x3] %v1191_v51 }
 0x29d   :  { %1215 = dma.vmem_to_hbm [thread:$0]  %s1211_s16, 32, %s1213_s3, [#allocation10]  }
 0x29e   :  { %1375 = dma.done.wait [#allocation5], 32  }
 0x29f   :  { %1376 = vsyncadd [#allocation5], 4294967264 }
 0x2a0   :  { %1377 = dma.done.wait [#allocation10], 32  }
 0x2a1   :  { %1378 = vsyncadd [#allocation10], 4294967264 }
 0x2a2   :  { %1224 = vsyncpa [#allocation4], 1 }
 0x2a3   :  { %1225 = vsyncpa [#allocation7], 1 }
 0x2a4   :  { %1226 = vsyncpa [#allocation5], 1 }
 0x2a5   :  { %1227 = vsyncpa [#allocation10], 1 }

</bundles_post_ra>
